<compile_context>
chip_gen: v7x
topology: tpu7x:2x2x1
jax: 0.10.0
libtpu: 0.0.40
codegen_flags: <defaults>
</compile_context>

<pallas_src>
import functools

import jax
import jax.numpy as jnp
import numpy as np
from jax import lax
from jax.experimental import pallas as pl
from jax.experimental.pallas import tpu as pltpu

REG_STRENGTH = 0.1
_BIG = 1e30  # Python float sentinel (weak-typed literal; never a captured jnp const)


def _uniform_matching_kernel(x_ref, o_ref, *, n, N, reg):
    f32 = jnp.float32
    x_row = x_ref[...].astype(f32)                        # (1, N); lanes >= n hold +_BIG

    lane = lax.broadcasted_iota(jnp.int32, (1, N), 1)     # 0..N-1 on lanes
    idx_r = lax.broadcasted_iota(jnp.int32, (N, N), 0)    # sublane (row) index
    idx_c = lax.broadcasted_iota(jnp.int32, (N, N), 1)    # lane (col) index
    eye = idx_r == idx_c

    # ---- stable ascending ranks (single orientation) -------------------------
    XJ = jnp.broadcast_to(x_row, (N, N))                  # [i, j] = x_j
    x_col = jnp.sum(jnp.where(eye, XJ, 0.0), axis=1, keepdims=True)   # (N, 1) = x_i
    XI = jnp.broadcast_to(x_col, (N, N))                  # [i, j] = x_i
    C = jnp.logical_or(XJ < XI, jnp.logical_and(XJ == XI, idx_c < idx_r))
    rank = jnp.sum(C.astype(f32), axis=1, keepdims=True)  # (N, 1) exact small ints
    # (padded +_BIG entries rank after all real ones, so real ranks are 0..n-1)

    # ---- scatter x into ascending order (exact f32 one-hot select) ------------
    onehot = (jnp.broadcast_to(rank, (N, N)) == idx_c.astype(f32)).astype(f32)
    sorted_row = jnp.sum(XI * onehot, axis=0, keepdims=True)   # (1, N)
    sorted_row = jnp.where(lane < n, sorted_row, 0.0)          # drop +_BIG pad values

    # ---- prefix sums of sorted x (row and column helpers, exact f32) ----------
    SORT = jnp.broadcast_to(sorted_row, (N, N))
    sorted_col = jnp.sum(jnp.where(eye, SORT, 0.0), axis=1, keepdims=True)          # (N,1)
    # S(k) = sum_{p<=k} sorted[p]  (row, k on lanes)
    S_row = jnp.sum(jnp.where(idx_r <= idx_c, jnp.broadcast_to(sorted_col, (N, N)), 0.0),
                    axis=0, keepdims=True)                                           # (1,N)
    # S(j-1)  (column, j on sublanes), with S(-1) = 0
    Sprev_col = jnp.sum(jnp.where(idx_c < idx_r, SORT, 0.0), axis=1, keepdims=True)  # (N,1)
    SK = jnp.broadcast_to(S_row, (N, N))                   # [j, k] = S(k)
    SPJ = jnp.broadcast_to(Sprev_col, (N, N))              # [j, k] = S(j-1)

    # ---- block means A[j,k] = mean(y[j..k]),  y_p = (n-p)/reg + sorted_p -------
    # w-part of the block sum in closed form (exact in f32 at these sizes):
    #   sum_{p=j..k} (n-p)/reg = ((k-j+1)*n - (k(k+1) - j(j-1))/2) / reg
    cnt = (idx_c - idx_r + 1).astype(f32)                  # k - j + 1
    kf = idx_c.astype(f32)
    jf = idx_r.astype(f32)
    wsum = (cnt * float(n) - (kf * (kf + 1.0) - jf * (jf - 1.0)) * 0.5) * (1.0 / reg)
    A = (wsum + (SK - SPJ)) / jnp.maximum(cnt, 1.0)
    valid = jnp.logical_and(idx_r <= idx_c, idx_c < n)     # j <= k < n
    A = jnp.where(valid, A, -_BIG)

    # ---- non-increasing isotonic regression via the min-max identity -----------
    #   v_i = min_{j<=i} max_{k>=i} A[j,k]
    # log-step doubling suffix-cummax along lanes, then one masked sublane min.
    M = A
    d = 1
    while d < N:
        rolled = jnp.roll(M, -d, axis=1)                   # rolled[:, i] = M[:, i+d] (wraps)
        M = jnp.maximum(M, jnp.where(idx_c < N - d, rolled, -_BIG))
        d *= 2
    v_row = jnp.min(jnp.where(idx_r <= idx_c, M, _BIG), axis=0, keepdims=True)   # (1, N)

    # ---- soft-sorted values and uniform-matching loss ---------------------------
    lane_f = lane.astype(f32)
    w_row = (float(n) - lane_f) * (1.0 / reg)              # (1, N): n/reg, (n-1)/reg, ...
    x_sorted = v_row - w_row
    i_seq = (lane_f + 1.0) * (1.0 / float(n))
    diff = jnp.abs(i_seq - x_sorted)
    diff = jnp.where(lane < n, diff, -1.0)                 # padded lanes never win the max
    o_ref[...] = jnp.max(diff, axis=1, keepdims=True)      # (1, 1)


def uniform_matching_loss(x):
    """x: (B,) array. Returns scalar f32 loss (same semantics as the torch module)."""
    n = int(x.shape[0])
    if n == 0:
        return jnp.float32(0.0)
    N = ((n + 127) // 128) * 128                           # lane-dense padding
    x_row = jnp.pad(x.astype(jnp.float32), (0, N - n),
                    constant_values=_BIG).reshape(1, N)
    kernel = functools.partial(_uniform_matching_kernel, n=n, N=N, reg=REG_STRENGTH)
    out = pl.pallas_call(
        kernel,
        grid=(1,),
        in_specs=[pl.BlockSpec((1, N), lambda i: (0, 0))],
        out_specs=pl.BlockSpec((1, 1), lambda i: (0, 0)),
        out_shape=jax.ShapeDtypeStruct((1, 1), jnp.float32),
        compiler_params=pltpu.CompilerParams(
            dimension_semantics=("arbitrary",),
            # ~a dozen live (N,N) f32 intermediates; comfortably under this for N <= 1024
            # and below v7x's 64 MiB physical VMEM.
            vmem_limit_bytes=48 * 1024 * 1024,
        ),
    )(x_row)
    return out[0, 0]


# ----------------------------- numpy reference -------------------------------
def _pav_nonincreasing(y):
    """L2 isotonic regression with non-increasing constraint (PAV)."""
    blocks = []  # (sum, count)
    for val in y:
        total, cnt = float(val), 1.0
        while blocks and blocks[-1][0] / blocks[-1][1] < total / cnt:
            pt, pc = blocks.pop()
            total += pt
            cnt += pc
        blocks.append((total, cnt))
    out = []
    for total, cnt in blocks:
        out.extend([total / cnt] * int(cnt))
    return np.asarray(out, dtype=np.float64)


def _reference_loss(x_np, reg=REG_STRENGTH):
    x = np.asarray(x_np, dtype=np.float64)
    n = x.shape[0]
    w = np.arange(n, 0, -1, dtype=np.float64) / reg
    s = -np.sort(x)                      # sort(-x, descending)
    sol = _pav_nonincreasing(w - s)
    x_sorted = sol - w                   # sign * (w - sol), sign = -1
    i_seq = np.arange(1, n + 1, dtype=np.float64) / n
    return float(np.max(np.abs(i_seq - x_sorted)))


if __name__ == "__main__":
    B = 16
    key = jax.random.PRNGKey(0)
    x = jax.random.uniform(key, (B,), dtype=jnp.float32)

    loss = jax.jit(uniform_matching_loss)(x)
    loss = jax.block_until_ready(loss)

    ref = _reference_loss(np.asarray(x))
    assert abs(float(loss) - ref) < 1e-3, (float(loss), ref)
    print("KERNEL_OK")
</pallas_src>

<mosaic_0001>
module attributes {stable_mosaic.version = 11 : i64} {
  func.func @_uniform_matching_kernel(%arg0: i32, %arg1: memref<1x128xf32, #tpu.memory_space<vmem>>, %arg2: memref<1x1xf32, #tpu.memory_space<vmem>>) attributes {dimension_semantics = [#tpu.dimension_semantics<arbitrary>], iteration_bounds = array<i64: 1>, scalar_prefetch = 0 : i64, scratch_operands = 0 : i64, tpu.core_type = #tpu.core_type<tc>, window_params = [{pipeline_mode = #tpu.pipeline_mode<synchronous>, transform_indices = @transform_0, window_bounds = array<i64: 1, 128>}, {pipeline_mode = #tpu.pipeline_mode<synchronous>, transform_indices = @transform_1, window_bounds = array<i64: 1, 1>}]} {
    %c0 = arith.constant 0 : index
    %c0_0 = arith.constant 0 : index
    %0 = vector.load %arg1[%c0, %c0_0] : memref<1x128xf32, #tpu.memory_space<vmem>>, vector<1x128xf32>
    %1 = tpu.iota {dimensions = array<i32: 1>} : vector<1x128xi32>
    %2 = tpu.iota {dimensions = array<i32: 0>} : vector<128x128xi32>
    %3 = tpu.iota {dimensions = array<i32: 1>} : vector<128x128xi32>
    %4 = arith.cmpi eq, %2, %3 : vector<128x128xi32>
    %5 = vector.shape_cast %0 : vector<1x128xf32> to vector<1x128xf32>
    %6 = vector.broadcast %5 : vector<1x128xf32> to vector<128x128xf32>
    %cst = arith.constant 0.000000e+00 : f32
    %7 = vector.broadcast %cst : f32 to vector<128x128xf32>
    %8 = arith.select %4, %6, %7 : vector<128x128xi1>, vector<128x128xf32>
    %cst_1 = arith.constant dense<0.000000e+00> : vector<128xf32>
    %9 = vector.multi_reduction <add>, %8, %cst_1 [1] : vector<128x128xf32> to vector<128xf32>
    %10 = vector.shape_cast %9 : vector<128xf32> to vector<128x1xf32>
    %11 = vector.shape_cast %10 : vector<128x1xf32> to vector<128x1xf32>
    %12 = vector.broadcast %11 : vector<128x1xf32> to vector<128x128xf32>
    %13 = arith.cmpf olt, %6, %12 : vector<128x128xf32>
    %14 = arith.cmpf oeq, %6, %12 : vector<128x128xf32>
    %15 = arith.cmpi slt, %3, %2 : vector<128x128xi32>
    %16 = arith.andi %14, %15 : vector<128x128xi1>
    %17 = arith.ori %13, %16 : vector<128x128xi1>
    %18 = arith.extui %17 : vector<128x128xi1> to vector<128x128xi32>
    %19 = arith.sitofp %18 : vector<128x128xi32> to vector<128x128xf32>
    %cst_2 = arith.constant dense<0.000000e+00> : vector<128xf32>
    %20 = vector.multi_reduction <add>, %19, %cst_2 [1] : vector<128x128xf32> to vector<128xf32>
    %21 = vector.shape_cast %20 : vector<128xf32> to vector<128x1xf32>
    %22 = vector.shape_cast %21 : vector<128x1xf32> to vector<128x1xf32>
    %23 = vector.broadcast %22 : vector<128x1xf32> to vector<128x128xf32>
    %24 = arith.sitofp %3 : vector<128x128xi32> to vector<128x128xf32>
    %25 = arith.cmpf oeq, %23, %24 : vector<128x128xf32>
    %26 = arith.extui %25 : vector<128x128xi1> to vector<128x128xi32>
    %27 = arith.sitofp %26 : vector<128x128xi32> to vector<128x128xf32>
    %28 = arith.mulf %12, %27 : vector<128x128xf32>
    %cst_3 = arith.constant dense<0.000000e+00> : vector<128xf32>
    %29 = vector.multi_reduction <add>, %28, %cst_3 [0] : vector<128x128xf32> to vector<128xf32>
    %30 = vector.shape_cast %29 : vector<128xf32> to vector<1x128xf32>
    %c16_i32 = arith.constant 16 : i32
    %31 = vector.broadcast %c16_i32 : i32 to vector<1x128xi32>
    %32 = arith.cmpi slt, %1, %31 : vector<1x128xi32>
    %cst_4 = arith.constant 0.000000e+00 : f32
    %33 = vector.broadcast %cst_4 : f32 to vector<1x128xf32>
    %34 = arith.select %32, %30, %33 : vector<1x128xi1>, vector<1x128xf32>
    %35 = vector.shape_cast %34 : vector<1x128xf32> to vector<1x128xf32>
    %36 = vector.broadcast %35 : vector<1x128xf32> to vector<128x128xf32>
    %cst_5 = arith.constant 0.000000e+00 : f32
    %37 = vector.broadcast %cst_5 : f32 to vector<128x128xf32>
    %38 = arith.select %4, %36, %37 : vector<128x128xi1>, vector<128x128xf32>
    %cst_6 = arith.constant dense<0.000000e+00> : vector<128xf32>
    %39 = vector.multi_reduction <add>, %38, %cst_6 [1] : vector<128x128xf32> to vector<128xf32>
    %40 = vector.shape_cast %39 : vector<128xf32> to vector<128x1xf32>
    %41 = arith.cmpi sle, %2, %3 : vector<128x128xi32>
    %42 = vector.shape_cast %40 : vector<128x1xf32> to vector<128x1xf32>
    %43 = vector.broadcast %42 : vector<128x1xf32> to vector<128x128xf32>
    %cst_7 = arith.constant 0.000000e+00 : f32
    %44 = vector.broadcast %cst_7 : f32 to vector<128x128xf32>
    %45 = arith.select %41, %43, %44 : vector<128x128xi1>, vector<128x128xf32>
    %cst_8 = arith.constant dense<0.000000e+00> : vector<128xf32>
    %46 = vector.multi_reduction <add>, %45, %cst_8 [0] : vector<128x128xf32> to vector<128xf32>
    %47 = vector.shape_cast %46 : vector<128xf32> to vector<1x128xf32>
    %48 = arith.cmpi slt, %3, %2 : vector<128x128xi32>
    %cst_9 = arith.constant 0.000000e+00 : f32
    %49 = vector.broadcast %cst_9 : f32 to vector<128x128xf32>
    %50 = arith.select %48, %36, %49 : vector<128x128xi1>, vector<128x128xf32>
    %cst_10 = arith.constant dense<0.000000e+00> : vector<128xf32>
    %51 = vector.multi_reduction <add>, %50, %cst_10 [1] : vector<128x128xf32> to vector<128xf32>
    %52 = vector.shape_cast %51 : vector<128xf32> to vector<128x1xf32>
    %53 = vector.shape_cast %47 : vector<1x128xf32> to vector<1x128xf32>
    %54 = vector.broadcast %53 : vector<1x128xf32> to vector<128x128xf32>
    %55 = vector.shape_cast %52 : vector<128x1xf32> to vector<128x1xf32>
    %56 = vector.broadcast %55 : vector<128x1xf32> to vector<128x128xf32>
    %57 = arith.subi %3, %2 : vector<128x128xi32>
    %c1_i32 = arith.constant 1 : i32
    %58 = vector.broadcast %c1_i32 : i32 to vector<128x128xi32>
    %59 = arith.addi %57, %58 : vector<128x128xi32>
    %60 = arith.sitofp %59 : vector<128x128xi32> to vector<128x128xf32>
    %61 = arith.sitofp %3 : vector<128x128xi32> to vector<128x128xf32>
    %62 = arith.sitofp %2 : vector<128x128xi32> to vector<128x128xf32>
    %cst_11 = arith.constant 1.600000e+01 : f32
    %63 = vector.broadcast %cst_11 : f32 to vector<128x128xf32>
    %64 = arith.mulf %60, %63 : vector<128x128xf32>
    %cst_12 = arith.constant 1.000000e+00 : f32
    %65 = vector.broadcast %cst_12 : f32 to vector<128x128xf32>
    %66 = arith.addf %61, %65 : vector<128x128xf32>
    %67 = arith.mulf %61, %66 : vector<128x128xf32>
    %cst_13 = arith.constant 1.000000e+00 : f32
    %68 = vector.broadcast %cst_13 : f32 to vector<128x128xf32>
    %69 = arith.subf %62, %68 : vector<128x128xf32>
    %70 = arith.mulf %62, %69 : vector<128x128xf32>
    %71 = arith.subf %67, %70 : vector<128x128xf32>
    %cst_14 = arith.constant 5.000000e-01 : f32
    %72 = vector.broadcast %cst_14 : f32 to vector<128x128xf32>
    %73 = arith.mulf %71, %72 : vector<128x128xf32>
    %74 = arith.subf %64, %73 : vector<128x128xf32>
    %cst_15 = arith.constant 1.000000e+01 : f32
    %75 = vector.broadcast %cst_15 : f32 to vector<128x128xf32>
    %76 = arith.mulf %74, %75 : vector<128x128xf32>
    %77 = arith.subf %54, %56 : vector<128x128xf32>
    %78 = arith.addf %76, %77 : vector<128x128xf32>
    %cst_16 = arith.constant 1.000000e+00 : f32
    %79 = vector.broadcast %cst_16 : f32 to vector<128x128xf32>
    %80 = arith.maximumf %60, %79 : vector<128x128xf32>
    %81 = arith.divf %78, %80 : vector<128x128xf32>
    %82 = arith.cmpi sle, %2, %3 : vector<128x128xi32>
    %c16_i32_17 = arith.constant 16 : i32
    %83 = vector.broadcast %c16_i32_17 : i32 to vector<128x128xi32>
    %84 = arith.cmpi slt, %3, %83 : vector<128x128xi32>
    %85 = arith.andi %82, %84 : vector<128x128xi1>
    %cst_18 = arith.constant -1.000000e+30 : f32
    %86 = vector.broadcast %cst_18 : f32 to vector<128x128xf32>
    %87 = arith.select %85, %81, %86 : vector<128x128xi1>, vector<128x128xf32>
    %88 = vector.extract_strided_slice %87 {offsets = [0, 1], sizes = [128, 127], strides = [1, 1]} : vector<128x128xf32> to vector<128x127xf32>
    %89 = vector.extract_strided_slice %87 {offsets = [0, 0], sizes = [128, 1], strides = [1, 1]} : vector<128x128xf32> to vector<128x1xf32>
    %90 = tpu.concatenate %88, %89 in 1 : vector<128x127xf32>, vector<128x1xf32> -> vector<128x128xf32>
    %c127_i32 = arith.constant 127 : i32
    %91 = vector.broadcast %c127_i32 : i32 to vector<128x128xi32>
    %92 = arith.cmpi slt, %3, %91 : vector<128x128xi32>
    %cst_19 = arith.constant -1.000000e+30 : f32
    %93 = vector.broadcast %cst_19 : f32 to vector<128x128xf32>
    %94 = arith.select %92, %90, %93 : vector<128x128xi1>, vector<128x128xf32>
    %95 = arith.maximumf %87, %94 : vector<128x128xf32>
    %96 = vector.extract_strided_slice %95 {offsets = [0, 2], sizes = [128, 126], strides = [1, 1]} : vector<128x128xf32> to vector<128x126xf32>
    %97 = vector.extract_strided_slice %95 {offsets = [0, 0], sizes = [128, 2], strides = [1, 1]} : vector<128x128xf32> to vector<128x2xf32>
    %98 = tpu.concatenate %96, %97 in 1 : vector<128x126xf32>, vector<128x2xf32> -> vector<128x128xf32>
    %c126_i32 = arith.constant 126 : i32
    %99 = vector.broadcast %c126_i32 : i32 to vector<128x128xi32>
    %100 = arith.cmpi slt, %3, %99 : vector<128x128xi32>
    %cst_20 = arith.constant -1.000000e+30 : f32
    %101 = vector.broadcast %cst_20 : f32 to vector<128x128xf32>
    %102 = arith.select %100, %98, %101 : vector<128x128xi1>, vector<128x128xf32>
    %103 = arith.maximumf %95, %102 : vector<128x128xf32>
    %104 = vector.extract_strided_slice %103 {offsets = [0, 4], sizes = [128, 124], strides = [1, 1]} : vector<128x128xf32> to vector<128x124xf32>
    %105 = vector.extract_strided_slice %103 {offsets = [0, 0], sizes = [128, 4], strides = [1, 1]} : vector<128x128xf32> to vector<128x4xf32>
    %106 = tpu.concatenate %104, %105 in 1 : vector<128x124xf32>, vector<128x4xf32> -> vector<128x128xf32>
    %c124_i32 = arith.constant 124 : i32
    %107 = vector.broadcast %c124_i32 : i32 to vector<128x128xi32>
    %108 = arith.cmpi slt, %3, %107 : vector<128x128xi32>
    %cst_21 = arith.constant -1.000000e+30 : f32
    %109 = vector.broadcast %cst_21 : f32 to vector<128x128xf32>
    %110 = arith.select %108, %106, %109 : vector<128x128xi1>, vector<128x128xf32>
    %111 = arith.maximumf %103, %110 : vector<128x128xf32>
    %112 = vector.extract_strided_slice %111 {offsets = [0, 8], sizes = [128, 120], strides = [1, 1]} : vector<128x128xf32> to vector<128x120xf32>
    %113 = vector.extract_strided_slice %111 {offsets = [0, 0], sizes = [128, 8], strides = [1, 1]} : vector<128x128xf32> to vector<128x8xf32>
    %114 = tpu.concatenate %112, %113 in 1 : vector<128x120xf32>, vector<128x8xf32> -> vector<128x128xf32>
    %c120_i32 = arith.constant 120 : i32
    %115 = vector.broadcast %c120_i32 : i32 to vector<128x128xi32>
    %116 = arith.cmpi slt, %3, %115 : vector<128x128xi32>
    %cst_22 = arith.constant -1.000000e+30 : f32
    %117 = vector.broadcast %cst_22 : f32 to vector<128x128xf32>
    %118 = arith.select %116, %114, %117 : vector<128x128xi1>, vector<128x128xf32>
    %119 = arith.maximumf %111, %118 : vector<128x128xf32>
    %120 = vector.extract_strided_slice %119 {offsets = [0, 16], sizes = [128, 112], strides = [1, 1]} : vector<128x128xf32> to vector<128x112xf32>
    %121 = vector.extract_strided_slice %119 {offsets = [0, 0], sizes = [128, 16], strides = [1, 1]} : vector<128x128xf32> to vector<128x16xf32>
    %122 = tpu.concatenate %120, %121 in 1 : vector<128x112xf32>, vector<128x16xf32> -> vector<128x128xf32>
    %c112_i32 = arith.constant 112 : i32
    %123 = vector.broadcast %c112_i32 : i32 to vector<128x128xi32>
    %124 = arith.cmpi slt, %3, %123 : vector<128x128xi32>
    %cst_23 = arith.constant -1.000000e+30 : f32
    %125 = vector.broadcast %cst_23 : f32 to vector<128x128xf32>
    %126 = arith.select %124, %122, %125 : vector<128x128xi1>, vector<128x128xf32>
    %127 = arith.maximumf %119, %126 : vector<128x128xf32>
    %128 = vector.extract_strided_slice %127 {offsets = [0, 32], sizes = [128, 96], strides = [1, 1]} : vector<128x128xf32> to vector<128x96xf32>
    %129 = vector.extract_strided_slice %127 {offsets = [0, 0], sizes = [128, 32], strides = [1, 1]} : vector<128x128xf32> to vector<128x32xf32>
    %130 = tpu.concatenate %128, %129 in 1 : vector<128x96xf32>, vector<128x32xf32> -> vector<128x128xf32>
    %c96_i32 = arith.constant 96 : i32
    %131 = vector.broadcast %c96_i32 : i32 to vector<128x128xi32>
    %132 = arith.cmpi slt, %3, %131 : vector<128x128xi32>
    %cst_24 = arith.constant -1.000000e+30 : f32
    %133 = vector.broadcast %cst_24 : f32 to vector<128x128xf32>
    %134 = arith.select %132, %130, %133 : vector<128x128xi1>, vector<128x128xf32>
    %135 = arith.maximumf %127, %134 : vector<128x128xf32>
    %136 = vector.extract_strided_slice %135 {offsets = [0, 64], sizes = [128, 64], strides = [1, 1]} : vector<128x128xf32> to vector<128x64xf32>
    %137 = vector.extract_strided_slice %135 {offsets = [0, 0], sizes = [128, 64], strides = [1, 1]} : vector<128x128xf32> to vector<128x64xf32>
    %138 = tpu.concatenate %136, %137 in 1 : vector<128x64xf32>, vector<128x64xf32> -> vector<128x128xf32>
    %c64_i32 = arith.constant 64 : i32
    %139 = vector.broadcast %c64_i32 : i32 to vector<128x128xi32>
    %140 = arith.cmpi slt, %3, %139 : vector<128x128xi32>
    %cst_25 = arith.constant -1.000000e+30 : f32
    %141 = vector.broadcast %cst_25 : f32 to vector<128x128xf32>
    %142 = arith.select %140, %138, %141 : vector<128x128xi1>, vector<128x128xf32>
    %143 = arith.maximumf %135, %142 : vector<128x128xf32>
    %144 = arith.cmpi sle, %2, %3 : vector<128x128xi32>
    %cst_26 = arith.constant 1.000000e+30 : f32
    %145 = vector.broadcast %cst_26 : f32 to vector<128x128xf32>
    %146 = arith.select %144, %143, %145 : vector<128x128xi1>, vector<128x128xf32>
    %cst_27 = arith.constant dense<0x7F800000> : vector<128xf32>
    %147 = vector.multi_reduction <minimumf>, %146, %cst_27 [0] : vector<128x128xf32> to vector<128xf32>
    %148 = vector.shape_cast %147 : vector<128xf32> to vector<1x128xf32>
    %149 = arith.sitofp %1 : vector<1x128xi32> to vector<1x128xf32>
    %cst_28 = arith.constant 1.600000e+01 : f32
    %150 = vector.broadcast %cst_28 : f32 to vector<1x128xf32>
    %151 = arith.subf %150, %149 : vector<1x128xf32>
    %cst_29 = arith.constant 1.000000e+01 : f32
    %152 = vector.broadcast %cst_29 : f32 to vector<1x128xf32>
    %153 = arith.mulf %151, %152 : vector<1x128xf32>
    %154 = arith.subf %148, %153 : vector<1x128xf32>
    %cst_30 = arith.constant 1.000000e+00 : f32
    %155 = vector.broadcast %cst_30 : f32 to vector<1x128xf32>
    %156 = arith.addf %149, %155 : vector<1x128xf32>
    %cst_31 = arith.constant 6.250000e-02 : f32
    %157 = vector.broadcast %cst_31 : f32 to vector<1x128xf32>
    %158 = arith.mulf %156, %157 : vector<1x128xf32>
    %159 = arith.subf %158, %154 : vector<1x128xf32>
    %160 = math.absf %159 : vector<1x128xf32>
    %c16_i32_32 = arith.constant 16 : i32
    %161 = vector.broadcast %c16_i32_32 : i32 to vector<1x128xi32>
    %162 = arith.cmpi slt, %1, %161 : vector<1x128xi32>
    %cst_33 = arith.constant -1.000000e+00 : f32
    %163 = vector.broadcast %cst_33 : f32 to vector<1x128xf32>
    %164 = arith.select %162, %160, %163 : vector<1x128xi1>, vector<1x128xf32>
    %cst_34 = arith.constant dense<0xFF800000> : vector<1xf32>
    %165 = vector.multi_reduction <maximumf>, %164, %cst_34 [1] : vector<1x128xf32> to vector<1xf32>
    %166 = vector.shape_cast %165 : vector<1xf32> to vector<1x1xf32>
    %c0_35 = arith.constant 0 : index
    %c0_36 = arith.constant 0 : index
    %167 = vector.load %arg2[%c0_35, %c0_36] : memref<1x1xf32, #tpu.memory_space<vmem>>, vector<1x1xf32>
    tpu.vector_store %arg2[%c0_35, %c0_36], %166 {strides = array<i32>} : memref<1x1xf32, #tpu.memory_space<vmem>>, vector<1x1xf32>,
    return
  }
  func.func @transform_0(%arg0: i32) -> (i32, i32) {
    %c0_i32 = arith.constant 0 : i32
    %c0_i32_0 = arith.constant 0 : i32
    %c0_i32_1 = arith.constant 0 : i32
    return %c0_i32, %c0_i32_0 : i32, i32
  }
  func.func @transform_1(%arg0: i32) -> (i32, i32) {
    %c0_i32 = arith.constant 0 : i32
    %c0_i32_0 = arith.constant 0 : i32
    %c0_i32_1 = arith.constant 0 : i32
    return %c0_i32, %c0_i32_0 : i32, i32
  }
}

</mosaic_0001>

<bundles_post_ra>
// kernel: uniform_matching_loss.1
= control target key start
LH: loop header
LB: loop body
LE: loop exit
PB: predicated region body
PF: predicated region fallthrough
CT: control target
= control target key end

     0   :  { %v10_v0 = vlaneseq  ;;  %s3382_s0 = inlined_call_operand.vmem [shape: f32[1,128], index: 0, kind: input, shape index: {}]   ;;  %s3383_s1 = inlined_call_operand.hbm [shape: f32[1,1], index: 1, kind: output, shape index: {}]  }
   0x1   :  { %6 = vsyncpa [#allocation3], 0  ;;  %v1647_v1 = vld [vmem:[%s3382_s0] ss:$0 sm:$0xff]  ;;  %v1625_v38 = vmov 0.0   ;;  %s1626_s0 = smov 127  }
   0x2   :  { %v1649_v2 = vand.u32 127, %v10_v0  ;;  %v1651_v3 = vshrl.u32 %v10_v0, 7  ;;  %s1627_s8 = smov 126   ;;  %s1628_s9 = smov 124  }
   0x3   :  { %s1629_s10 = smov 120   ;;  %s1630_s11 = smov 112  }
   0x4   :  { %3427 = vst [vmem:[#allocation5_spill] sm:$0xff] %v1651_v3  ;;  %vm29_vm0 = vcmp.eq.s32.totalorder %v1651_v3, %v1649_v2  ;;  %v1656_v4 = vadd.s32 16, %v1651_v3  ;;  %v1659_v5 = vadd.s32 8, %v1651_v3  ;;  %v1662_v6 = vadd.s32 24, %v1651_v3  ;;  %s1631_s12 = smov 96   ;;  %s1632_s13 = smov 64  }
   0x5   :  { %v51_v7 = vsel %vm29_vm0, %v1647_v1, 0.0  ;;  %v1669_v8 = vadd.s32 32, %v1651_v3  ;;  %v1678_v9 = vadd.s32 40, %v1651_v3  ;;  %v1691_v12 = vadd.s32 48, %v1651_v3  ;;  %s1633_s14 = smov [#allocation2]  }
   0x6   :  { %67 = vadd.xlane.f32.xlu0 %v51_v7  ;;  %vm31_vm1 = vcmp.eq.s32.totalorder %v1656_v4, %v1649_v2  ;;  %vm30_vm2 = vcmp.eq.s32.totalorder %v1659_v5, %v1649_v2  ;;  %vm32_vm3 = vcmp.eq.s32.totalorder %v1662_v6, %v1649_v2  ;;  %v1700_v14 = vadd.s32 56, %v1651_v3  ;;  %s1503_s15 = sshll.u32 %s1633_s14, 4  ;;  %s1504_s15 = int_to_ptr.vmem [resolvable:$true] %s1503_s15 }
   0x7   :  { %v53_v10 = vsel %vm31_vm1, %v1647_v1, 0.0  ;;  %v52_v11 = vsel %vm30_vm2, %v1647_v1, 0.0  ;;  %vm33_vm4 = vcmp.eq.s32.totalorder %v1669_v8, %v1649_v2  ;;  %v54_v13 = vsel %vm32_vm3, %v1647_v1, 0.0  ;;  %s1601_s16 = scalar_lea.vmem %s1504_s15, 16  ;;  %s1605_s17 = scalar_lea.vmem %s1504_s15, 32 }
   0x8   :  { %71 = vadd.xlane.f32.xlu1 %v53_v10  ;;  %vm34_vm5 = vcmp.eq.s32.totalorder %v1678_v9, %v1649_v2  ;;  %v55_v15 = vsel %vm33_vm4, %v1647_v1, 0.0  ;;  %vm3392_vm6 = vcmp.eq.s32.totalorder %v1691_v12, %v1649_v2  ;;  %v1709_v16 = vadd.s32 64, %v1651_v3  ;;  %p1602_p0 = scmp.ne.s32.totalorder %s1504_s15, %s1601_s16  ;;  %p1606_p1 = scmp.lt.s32.totalorder %s1504_s15, %s1504_s15 }
   0x9   :  { %v56_v17 = vsel %vm34_vm5, %v1647_v1, 0.0  ;;  %vm3393_vm7 = vcmp.eq.s32.totalorder %v1700_v14, %v1649_v2  ;;  %v1718_v18 = vadd.s32 72, %v1651_v3  ;;  %v57_v19 = vsel %vm3392_vm6, %v1647_v1, 0.0  ;;  %p1607_p2 = scmp.lt.s32.totalorder %s1605_s17, %s1601_s16 }
   0xa   :  { %69 = vadd.xlane.f32.xlu0 %v52_v11  ;;  %vm3390_vm8 = vcmp.eq.s32.totalorder %v1709_v16, %v1649_v2  ;;  %v1727_v20 = vadd.s32 80, %v1651_v3  ;;  %v58_v21 = vsel %vm3393_vm7, %v1647_v1, 0.0  ;;  %v1736_v22 = vadd.s32 88, %v1651_v3 }
   0xb   :  { %3428 = vst [vmem:[#allocation6_spill] sm:$0xff] %v1718_v18  ;;  %vm3391_vm9 = vcmp.eq.s32.totalorder %v1718_v18, %v1649_v2  ;;  %v59_v23 = vsel %vm3390_vm8, %v1647_v1, 0.0  ;;  %v1745_v24 = vadd.s32 96, %v1651_v3  ;;  %v1754_v26 = vadd.s32 104, %v1651_v3  ;;  %p1608_p3 = por %p1607_p2, %p1606_p1 }
   0xc   :  { %73 = vadd.xlane.f32.xlu1 %v54_v13  ;;  %3429 = vst [vmem:[#allocation7_spill] sm:$0xff] %v1727_v20  ;;  %3430 = vst [vmem:[#allocation8_spill] sm:$0xff] %v1736_v22  ;;  %vm3386_vm10 = vcmp.eq.s32.totalorder %v1727_v20, %v1649_v2  ;;  %v60_v25 = vsel %vm3391_vm9, %v1647_v1, 0.0  ;;  %vm3389_vm11 = vcmp.eq.s32.totalorder %v1736_v22, %v1649_v2  ;;  %v1763_v28 = vadd.s32 112, %v1651_v3 }
   0xd   :  { %3431 = vst [vmem:[#allocation9_spill] sm:$0xff] %v1745_v24  ;;  %3432 = vst [vmem:[#allocation10_spill] sm:$0xff] %v1754_v26  ;;  %v61_v27 = vsel %vm3386_vm10, %v1647_v1, 0.0  ;;  %vm3384_vm12 = vcmp.eq.s32.totalorder %v1745_v24, %v1649_v2  ;;  %v62_v29 = vsel %vm3389_vm11, %v1647_v1, 0.0  ;;  %vm3385_vm13 = vcmp.eq.s32.totalorder %v1754_v26, %v1649_v2  ;;  %p1609_p4 = pnand %p1608_p3, %p1602_p0 }
   0xe   :  { %75 = vadd.xlane.f32.xlu0 %v55_v15  ;;  %v1772_v30 = vadd.s32 120, %v1651_v3  ;;  %v63_v31 = vsel %vm3384_vm12, %v1647_v1, 0.0  ;;  %vm3387_vm14 = vcmp.eq.s32.totalorder %v1763_v28, %v1649_v2  ;;  %v64_v32 = vsel %vm3385_vm13, %v1647_v1, 0.0 }
   0xf   :  { %v65_v33 = vsel %vm3387_vm14, %v1647_v1, 0.0  ;;  %vm3394_vm12 = vcmp.lt.s32.totalorder %v1649_v2, %v1651_v3  ;;  %vm3395_vm14 = vcmp.lt.s32.totalorder %v1649_v2, %v1656_v4  ;;  %vm3396_vm6 = vcmp.lt.s32.totalorder %v1649_v2, %v1659_v5 }
  0x10   :  { %77 = vadd.xlane.f32.xlu1 %v56_v17  ;;  %vm3388_vm15 = vcmp.eq.s32.totalorder %v1772_v30, %v1649_v2  ;;  %v1987_v13 = vcvt.s32.f32 %v1649_v2 }
  0x11   :  { %v66_v34 = vsel %vm3388_vm15, %v1647_v1, 0.0 }
  0x12   :  { %79 = vadd.xlane.f32.xlu0 %v57_v19  ;;  %3433 = vst [vmem:[#allocation11_spill] sm:$0xff] %v1987_v13 }
  0x14   :  { %81 = vadd.xlane.f32.xlu1 %v58_v21 }
  0x16   :  { %83 = vadd.xlane.f32.xlu0 %v59_v23 }
  0x18   :  { %85 = vadd.xlane.f32.xlu1 %v60_v25 }
  0x1a   :  { %87 = vadd.xlane.f32.xlu0 %v61_v27 }
  0x1c   :  { %89 = vadd.xlane.f32.xlu1 %v62_v29 }
  0x1e   :  { %91 = vadd.xlane.f32.xlu0 %v63_v31 }
  0x20   :  { %93 = vadd.xlane.f32.xlu1 %v64_v32 }
  0x22   :  { %95 = vadd.xlane.f32.xlu0 %v65_v33 }
  0x24   :  { %97 = vadd.xlane.f32.xlu1 %v66_v34 }
  0x93   :  { %v1796_v35 = vpop.xlane.xlu0 %67 }
  0x94   :  { %vm99_vm13 = vcmp.lt.f32.partialorder %v1647_v1, %v1796_v35  ;;  %vm115_vm10 = vcmp.eq.f32.partialorder %v1647_v1, %v1796_v35 }
  0x95   :  { %v1804_v36 = vpop.xlane.xlu1 %71  ;;  %vm147_vm15 = vmand %vm115_vm10, %vm3394_vm12  ;;  %vm3397_vm12 = vcmp.lt.s32.totalorder %v1649_v2, %v1662_v6 }
  0x96   :  { %vm163_vm11 = vmor %vm99_vm13, %vm147_vm15  ;;  %vm101_vm8 = vcmp.lt.f32.partialorder %v1647_v1, %v1804_v36  ;;  %vm117_vm9 = vcmp.eq.f32.partialorder %v1647_v1, %v1804_v36 }
  0x97   :  { %v1815_v37 = vpop.xlane.xlu0 %69  ;;  %v1512_v39 = vsel %vm163_vm11, 1.0, %v1625_v38  ;;  %vm149_vm7 = vmand %vm117_vm9, %vm3395_vm14  ;;  %vm3398_vm14 = vcmp.lt.s32.totalorder %v1649_v2, %v1669_v8 }
  0x98   :  { %211 = vadd.xlane.f32.xlu0 %v1512_v39  ;;  %vm165_vm10 = vmor %vm101_vm8, %vm149_vm7  ;;  %vm100_vm13 = vcmp.lt.f32.partialorder %v1647_v1, %v1815_v37  ;;  %vm116_vm15 = vcmp.eq.f32.partialorder %v1647_v1, %v1815_v37 }
  0x99   :  { %v1827_v40 = vpop.xlane.xlu1 %73  ;;  %v1514_v41 = vsel %vm165_vm10, 1.0, %v1625_v38  ;;  %vm148_vm11 = vmand %vm116_vm15, %vm3396_vm6  ;;  %vm3399_vm6 = vcmp.lt.s32.totalorder %v1649_v2, %v1678_v9 }
  0x9a   :  { %vm164_vm9 = vmor %vm100_vm13, %vm148_vm11  ;;  %vm102_vm7 = vcmp.lt.f32.partialorder %v1647_v1, %v1827_v40  ;;  %vm118_vm8 = vcmp.eq.f32.partialorder %v1647_v1, %v1827_v40 }
  0x9b   :  { %v1839_v42 = vpop.xlane.xlu0 %75  ;;  %v1513_v43 = vsel %vm164_vm9, 1.0, %v1625_v38  ;;  %vm150_vm10 = vmand %vm118_vm8, %vm3397_vm12  ;;  %vm3400_vm12 = vcmp.lt.s32.totalorder %v1649_v2, %v1691_v12 }
  0x9c   :  { %215 = vadd.xlane.f32.xlu0 %v1514_v41  ;;  %213 = vadd.xlane.f32.xlu1 %v1513_v43  ;;  %vm166_vm13 = vmor %vm102_vm7, %vm150_vm10  ;;  %vm103_vm15 = vcmp.lt.f32.partialorder %v1647_v1, %v1839_v42  ;;  %vm119_vm11 = vcmp.eq.f32.partialorder %v1647_v1, %v1839_v42 }
  0x9d   :  { %v1851_v44 = vpop.xlane.xlu1 %77  ;;  %v1515_v45 = vsel %vm166_vm13, 1.0, %v1625_v38  ;;  %vm151_vm9 = vmand %vm119_vm11, %vm3398_vm14  ;;  %vm3401_vm14 = vcmp.lt.s32.totalorder %v1649_v2, %v1700_v14 }
  0x9e   :  { %vm167_vm8 = vmor %vm103_vm15, %vm151_vm9  ;;  %vm104_vm7 = vcmp.lt.f32.partialorder %v1647_v1, %v1851_v44  ;;  %vm120_vm10 = vcmp.eq.f32.partialorder %v1647_v1, %v1851_v44 }
  0x9f   :  { %v1863_v46 = vpop.xlane.xlu0 %79  ;;  %v1516_v47 = vsel %vm167_vm8, 1.0, %v1625_v38  ;;  %vm152_vm13 = vmand %vm120_vm10, %vm3399_vm6  ;;  %vm3402_vm6 = vcmp.lt.s32.totalorder %v1649_v2, %v1709_v16 }
  0xa0   :  { %217 = vadd.xlane.f32.xlu1 %v1515_v45  ;;  %219 = vadd.xlane.f32.xlu0 %v1516_v47  ;;  %vm168_vm15 = vmor %vm104_vm7, %vm152_vm13  ;;  %vm105_vm11 = vcmp.lt.f32.partialorder %v1647_v1, %v1863_v46  ;;  %vm121_vm9 = vcmp.eq.f32.partialorder %v1647_v1, %v1863_v46 }
  0xa1   :  { %v1875_v48 = vpop.xlane.xlu1 %81  ;;  %v1517_v49 = vsel %vm168_vm15, 1.0, %v1625_v38  ;;  %vm153_vm8 = vmand %vm121_vm9, %vm3400_vm12  ;;  %vm3403_vm12 = vcmp.lt.s32.totalorder %v1649_v2, %v1718_v18 }
  0xa2   :  { %vm169_vm10 = vmor %vm105_vm11, %vm153_vm8  ;;  %vm106_vm7 = vcmp.lt.f32.partialorder %v1647_v1, %v1875_v48  ;;  %vm122_vm13 = vcmp.eq.f32.partialorder %v1647_v1, %v1875_v48 }
  0xa3   :  { %v1887_v50 = vpop.xlane.xlu0 %83  ;;  %v1518_v51 = vsel %vm169_vm10, 1.0, %v1625_v38  ;;  %vm154_vm15 = vmand %vm122_vm13, %vm3401_vm14  ;;  %vm3404_vm14 = vcmp.lt.s32.totalorder %v1649_v2, %v1727_v20 }
  0xa4   :  { %221 = vadd.xlane.f32.xlu1 %v1517_v49  ;;  %223 = vadd.xlane.f32.xlu0 %v1518_v51  ;;  %vm170_vm11 = vmor %vm106_vm7, %vm154_vm15  ;;  %vm107_vm9 = vcmp.lt.f32.partialorder %v1647_v1, %v1887_v50  ;;  %vm123_vm8 = vcmp.eq.f32.partialorder %v1647_v1, %v1887_v50 }
  0xa5   :  { %v1899_v52 = vpop.xlane.xlu1 %85  ;;  %v1519_v53 = vsel %vm170_vm11, 1.0, %v1625_v38  ;;  %vm155_vm10 = vmand %vm123_vm8, %vm3402_vm6  ;;  %vm3405_vm6 = vcmp.lt.s32.totalorder %v1649_v2, %v1736_v22 }
  0xa6   :  { %vm171_vm13 = vmor %vm107_vm9, %vm155_vm10  ;;  %vm108_vm7 = vcmp.lt.f32.partialorder %v1647_v1, %v1899_v52  ;;  %vm124_vm15 = vcmp.eq.f32.partialorder %v1647_v1, %v1899_v52 }
  0xa7   :  { %v1911_v54 = vpop.xlane.xlu0 %87  ;;  %v1520_v55 = vsel %vm171_vm13, 1.0, %v1625_v38  ;;  %vm156_vm11 = vmand %vm124_vm15, %vm3403_vm12  ;;  %vm3406_vm12 = vcmp.lt.s32.totalorder %v1649_v2, %v1745_v24 }
  0xa8   :  { %225 = vadd.xlane.f32.xlu1 %v1519_v53  ;;  %227 = vadd.xlane.f32.xlu0 %v1520_v55  ;;  %vm172_vm9 = vmor %vm108_vm7, %vm156_vm11  ;;  %vm109_vm8 = vcmp.lt.f32.partialorder %v1647_v1, %v1911_v54  ;;  %vm125_vm10 = vcmp.eq.f32.partialorder %v1647_v1, %v1911_v54 }
  0xa9   :  { %v1923_v56 = vpop.xlane.xlu1 %89  ;;  %v1521_v57 = vsel %vm172_vm9, 1.0, %v1625_v38  ;;  %vm157_vm13 = vmand %vm125_vm10, %vm3404_vm14  ;;  %vm3407_vm14 = vcmp.lt.s32.totalorder %v1649_v2, %v1754_v26 }
  0xaa   :  { %vm173_vm15 = vmor %vm109_vm8, %vm157_vm13  ;;  %vm110_vm7 = vcmp.lt.f32.partialorder %v1647_v1, %v1923_v56  ;;  %vm126_vm11 = vcmp.eq.f32.partialorder %v1647_v1, %v1923_v56 }
  0xab   :  { %v1935_v58 = vpop.xlane.xlu0 %91  ;;  %v1522_v59 = vsel %vm173_vm15, 1.0, %v1625_v38  ;;  %vm158_vm9 = vmand %vm126_vm11, %vm3405_vm6  ;;  %vm145_vm6 = vcmp.lt.s32.totalorder %v1649_v2, %v1763_v28 }
  0xac   :  { %229 = vadd.xlane.f32.xlu1 %v1521_v57  ;;  %231 = vadd.xlane.f32.xlu0 %v1522_v59  ;;  %vm174_vm8 = vmor %vm110_vm7, %vm158_vm9  ;;  %vm111_vm10 = vcmp.lt.f32.partialorder %v1647_v1, %v1935_v58  ;;  %vm127_vm13 = vcmp.eq.f32.partialorder %v1647_v1, %v1935_v58 }
  0xad   :  { %v1947_v60 = vpop.xlane.xlu1 %93  ;;  %v1523_v61 = vsel %vm174_vm8, 1.0, %v1625_v38  ;;  %vm159_vm15 = vmand %vm127_vm13, %vm3406_vm12  ;;  %vm146_vm12 = vcmp.lt.s32.totalorder %v1649_v2, %v1772_v30 }
  0xae   :  { %vm175_vm11 = vmor %vm111_vm10, %vm159_vm15  ;;  %vm112_vm7 = vcmp.lt.f32.partialorder %v1647_v1, %v1947_v60  ;;  %vm128_vm9 = vcmp.eq.f32.partialorder %v1647_v1, %v1947_v60 }
  0xaf   :  { %v1959_v62 = vpop.xlane.xlu0 %95  ;;  %v1524_v63 = vsel %vm175_vm11, 1.0, %v1625_v38  ;;  %vm160_vm8 = vmand %vm128_vm9, %vm3407_vm14 }
  0xb0   :  { %233 = vadd.xlane.f32.xlu1 %v1523_v61  ;;  %235 = vadd.xlane.f32.xlu0 %v1524_v63  ;;  %vm176_vm10 = vmor %vm112_vm7, %vm160_vm8  ;;  %vm113_vm13 = vcmp.lt.f32.partialorder %v1647_v1, %v1959_v62  ;;  %vm129_vm15 = vcmp.eq.f32.partialorder %v1647_v1, %v1959_v62 }
  0xb1   :  { %v1971_v0 = vpop.xlane.xlu1 %97  ;;  %v1525_v7 = vsel %vm176_vm10, 1.0, %v1625_v38  ;;  %vm161_vm11 = vmand %vm129_vm15, %vm145_vm6 }
  0xb2   :  { %vm177_vm9 = vmor %vm113_vm13, %vm161_vm11  ;;  %vm114_vm7 = vcmp.lt.f32.partialorder %v1647_v1, %v1971_v0  ;;  %vm130_vm8 = vcmp.eq.f32.partialorder %v1647_v1, %v1971_v0 }
  0xb3   :  { %v1526_v10 = vsel %vm177_vm9, 1.0, %v1625_v38  ;;  %vm162_vm14 = vmand %vm130_vm8, %vm146_vm12 }
  0xb4   :  { %237 = vadd.xlane.f32.xlu1 %v1525_v7  ;;  %239 = vadd.xlane.f32.xlu0 %v1526_v10  ;;  %vm178_vm10 = vmor %vm114_vm7, %vm162_vm14 }
  0xb5   :  { %v1527_v11 = vsel %vm178_vm10, 1.0, %v1625_v38 }
  0xb8   :  { %241 = vadd.xlane.f32.xlu1 %v1527_v11 }
 0x125   :  { %v212_v15 = vpop.xlane.xlu0 %211 }
 0x126   :  { %vm244_vm13 = vcmp.eq.f32.partialorder %v212_v15, %v1987_v13 }
 0x127   :  { %v1528_v1 = vsel %vm244_vm13, 1.0, %v1625_v38 }
 0x128   :  { %v292_v25 = vmul.f32 %v1528_v1, %v1796_v35 }
 0x129   :  { %v214_v17 = vpop.xlane.xlu1 %213  ;;  %v216_v19 = vpop.xlane.xlu0 %215 }
 0x12a   :  { %vm245_vm15 = vcmp.eq.f32.partialorder %v214_v17, %v1987_v13  ;;  %vm246_vm11 = vcmp.eq.f32.partialorder %v216_v19, %v1987_v13 }
 0x12b   :  { %v1529_v21 = vsel %vm245_vm15, 1.0, %v1625_v38  ;;  %v1530_v23 = vsel %vm246_vm11, 1.0, %v1625_v38 }
 0x12c   :  { %v293_v27 = vmul.f32 %v1529_v21, %v1815_v37  ;;  %v294_v33 = vmul.f32 %v1530_v23, %v1804_v36 }
 0x12d   :  { %v218_v29 = vpop.xlane.xlu1 %217  ;;  %v220_v31 = vpop.xlane.xlu0 %219 }
 0x12e   :  { %v308_v32 = vadd.f32 %v293_v27, %v292_v25  ;;  %vm247_vm14 = vcmp.eq.f32.partialorder %v218_v29, %v1987_v13  ;;  %vm248_vm9 = vcmp.eq.f32.partialorder %v220_v31, %v1987_v13 }
 0x12f   :  { %v1531_v34 = vsel %vm247_vm14, 1.0, %v1625_v38  ;;  %v1532_v39 = vsel %vm248_vm9, 1.0, %v1625_v38 }
 0x130   :  { %v309_v41 = vadd.f32 %v308_v32, %v294_v33  ;;  %v295_v43 = vmul.f32 %v1531_v34, %v1827_v40  ;;  %v296_v37 = vmul.f32 %v1532_v39, %v1839_v42 }
 0x131   :  { %v222_v45 = vpop.xlane.xlu1 %221  ;;  %v224_v35 = vpop.xlane.xlu0 %223 }
 0x132   :  { %v310_v47 = vadd.f32 %v309_v41, %v295_v43  ;;  %vm249_vm7 = vcmp.eq.f32.partialorder %v222_v45, %v1987_v13  ;;  %vm250_vm8 = vcmp.eq.f32.partialorder %v224_v35, %v1987_v13 }
 0x133   :  { %v1533_v36 = vsel %vm249_vm7, 1.0, %v1625_v38  ;;  %v1534_v49 = vsel %vm250_vm8, 1.0, %v1625_v38 }
 0x134   :  { %v311_v51 = vadd.f32 %v310_v47, %v296_v37  ;;  %v297_v53 = vmul.f32 %v1533_v36, %v1851_v44  ;;  %v298_v40 = vmul.f32 %v1534_v49, %v1863_v46 }
 0x135   :  { %v226_v55 = vpop.xlane.xlu1 %225  ;;  %v228_v57 = vpop.xlane.xlu0 %227 }
 0x136   :  { %v312_v59 = vadd.f32 %v311_v51, %v297_v53  ;;  %vm251_vm10 = vcmp.eq.f32.partialorder %v226_v55, %v1987_v13  ;;  %vm252_vm13 = vcmp.eq.f32.partialorder %v228_v57, %v1987_v13 }
 0x137   :  { %v1535_v42 = vsel %vm251_vm10, 1.0, %v1625_v38  ;;  %v1536_v61 = vsel %vm252_vm13, 1.0, %v1625_v38  ;;  %vm329_vm13 = vcmp.lt.s32.totalorder %v1649_v2, 16 }
 0x138   :  { %v313_v63 = vadd.f32 %v312_v59, %v298_v40  ;;  %v299_v7 = vmul.f32 %v1535_v42, %v1875_v48  ;;  %v300_v44 = vmul.f32 %v1536_v61, %v1887_v50 }
 0x139   :  { %v230_v10 = vpop.xlane.xlu1 %229  ;;  %v232_v11 = vpop.xlane.xlu0 %231 }
 0x13a   :  { %v314_v15 = vadd.f32 %v313_v63, %v299_v7  ;;  %vm253_vm15 = vcmp.eq.f32.partialorder %v230_v10, %v1987_v13  ;;  %vm254_vm11 = vcmp.eq.f32.partialorder %v232_v11, %v1987_v13 }
 0x13b   :  { %v1537_v46 = vsel %vm253_vm15, 1.0, %v1625_v38  ;;  %v1538_v1 = vsel %vm254_vm11, 1.0, %v1625_v38  ;;  %vm3440_vm15 = vcmp.eq.s32.totalorder %v1754_v26, %v1649_v2  ;;  %vm3441_vm11 = vcmp.eq.s32.totalorder %v1745_v24, %v1649_v2 }
 0x13c   :  { %v315_v17 = vadd.f32 %v314_v15, %v300_v44  ;;  %v301_v19 = vmul.f32 %v1537_v46, %v1899_v52  ;;  %v302_v48 = vmul.f32 %v1538_v1, %v1911_v54 }
 0x13d   :  { %v234_v21 = vpop.xlane.xlu1 %233  ;;  %v236_v23 = vpop.xlane.xlu0 %235 }
 0x13e   :  { %v316_v25 = vadd.f32 %v315_v17, %v301_v19  ;;  %vm255_vm14 = vcmp.eq.f32.partialorder %v234_v21, %v1987_v13  ;;  %vm256_vm9 = vcmp.eq.f32.partialorder %v236_v23, %v1987_v13 }
 0x13f   :  { %v1539_v50 = vsel %vm255_vm14, 1.0, %v1625_v38  ;;  %v1540_v27 = vsel %vm256_vm9, 1.0, %v1625_v38  ;;  %vm3442_vm14 = vcmp.eq.s32.totalorder %v1772_v30, %v1649_v2  ;;  %vm3443_vm9 = vcmp.eq.s32.totalorder %v1763_v28, %v1649_v2 }
 0x140   :  { %v317_v29 = vadd.f32 %v316_v25, %v302_v48  ;;  %v303_v31 = vmul.f32 %v1539_v50, %v1923_v56  ;;  %v304_v52 = vmul.f32 %v1540_v27, %v1935_v58 }
 0x141   :  { %v238_v32 = vpop.xlane.xlu1 %237  ;;  %v240_v33 = vpop.xlane.xlu0 %239 }
 0x142   :  { %v318_v34 = vadd.f32 %v317_v29, %v303_v31  ;;  %vm257_vm7 = vcmp.eq.f32.partialorder %v238_v32, %v1987_v13  ;;  %vm258_vm8 = vcmp.eq.f32.partialorder %v240_v33, %v1987_v13 }
 0x143   :  { %v1541_v54 = vsel %vm257_vm7, 1.0, %v1625_v38  ;;  %v1542_v39 = vsel %vm258_vm8, 1.0, %v1625_v38  ;;  %vm3444_vm7 = vcmp.lt.s32.totalorder %v1649_v2, %v1659_v5  ;;  %vm3445_vm8 = vcmp.lt.s32.totalorder %v1649_v2, %v1651_v3 }
 0x144   :  { %v319_v41 = vadd.f32 %v318_v34, %v304_v52  ;;  %v305_v43 = vmul.f32 %v1541_v54, %v1947_v60  ;;  %v306_v56 = vmul.f32 %v1542_v39, %v1959_v62 }
 0x145   :  { %v242_v45 = vpop.xlane.xlu1 %241 }
 0x146   :  { %v320_v35 = vadd.f32 %v319_v41, %v305_v43  ;;  %vm259_vm10 = vcmp.eq.f32.partialorder %v242_v45, %v1987_v13  ;;  %v481_v45 = vsub.s32 %v1649_v2, %v1659_v5 }
 0x147   :  { %v1543_v47 = vsel %vm259_vm10, 1.0, %v1625_v38  ;;  %vm3446_vm10 = vcmp.lt.s32.totalorder %v1649_v2, %v1662_v6 }
 0x148   :  { %v321_v58 = vadd.f32 %v320_v35, %v306_v56  ;;  %v307_v37 = vmul.f32 %v1543_v47, %v1971_v0  ;;  %v480_v35 = vsub.s32 %v1649_v2, %v1651_v3  ;;  %v529_v56 = vcvt.s32.f32 %v1659_v5 }
 0x149   :  { %v483_v47 = vsub.s32 %v1649_v2, %v1662_v6 }
 0x14a   :  { %v322_v36 = vadd.f32 %v321_v58, %v307_v37  ;;  %v528_v58 = vcvt.s32.f32 %v1651_v3  ;;  %v531_v37 = vcvt.s32.f32 %v1662_v6 }
 0x14c   :  { %v323_v49 = vrot.slane %v322_v36, 4 }
 0x14e   :  { %v324_v51 = vadd.f32 %v323_v49, %v322_v36  ;;  %v497_v36 = vadd.s32 1, %v481_v45  ;;  %v496_v49 = vadd.s32 1, %v480_v35 }
 0x150   :  { %v325_v53 = vrot.slane %v324_v51, 2 }
 0x152   :  { %v326_v55 = vadd.f32 %v325_v53, %v324_v51  ;;  %v482_v51 = vsub.s32 %v1649_v2, %v1656_v4  ;;  %v2148_v53 = vadd.f32 1.0, %v1987_v13 }
 0x154   :  { %v327_v57 = vrot.slane %v326_v55, 1  ;;  %3458 = vst [vmem:[#allocation12_spill] sm:$0xff] %v2148_v53 }
 0x156   :  { %v328_v60 = vadd.f32 %v327_v57, %v326_v55  ;;  %v1545_v55 = vadd.f32 -1.0, %v529_v56  ;;  %v499_v57 = vadd.s32 1, %v483_v47 }
 0x158   :  { %v330_v59 = vsel %vm329_vm13, %v328_v60, 0.0  ;;  %v1544_v60 = vadd.f32 -1.0, %v528_v58 }
 0x159   :  { %v332_v62 = vsel %vm30_vm2, %v330_v59, 0.0  ;;  %v331_v38 = vsel %vm29_vm0, %v330_v59, 0.0  ;;  %v334_v0 = vsel %vm32_vm3, %v330_v59, 0.0  ;;  %v333_v40 = vsel %vm31_vm1, %v330_v59, 0.0 }
 0x15a   :  { %349 = vadd.xlane.f32.xlu1 %v332_v62  ;;  %347 = vadd.xlane.f32.xlu0 %v331_v38  ;;  %v336_v42 = vsel %vm34_vm5, %v330_v59, 0.0  ;;  %v335_v61 = vsel %vm33_vm4, %v330_v59, 0.0  ;;  %vm3434_vm0 = vcmp.eq.s32.totalorder %v1700_v14, %v1649_v2  ;;  %vm3435_vm2 = vcmp.eq.s32.totalorder %v1691_v12, %v1649_v2 }
 0x15b   :  { %v338_v63 = vsel %vm3434_vm0, %v330_v59, 0.0  ;;  %v337_v7 = vsel %vm3435_vm2, %v330_v59, 0.0  ;;  %vm3436_vm1 = vcmp.eq.s32.totalorder %v1718_v18, %v1649_v2  ;;  %vm3437_vm3 = vcmp.eq.s32.totalorder %v1709_v16, %v1649_v2 }
 0x15c   :  { %v340_v10 = vsel %vm3436_vm1, %v330_v59, 0.0  ;;  %v339_v11 = vsel %vm3437_vm3, %v330_v59, 0.0  ;;  %vm3438_vm4 = vcmp.eq.s32.totalorder %v1736_v22, %v1649_v2  ;;  %vm3439_vm5 = vcmp.eq.s32.totalorder %v1727_v20, %v1649_v2 }
 0x15d   :  { %v342_v15 = vsel %vm3438_vm4, %v330_v59, 0.0  ;;  %v341_v44 = vsel %vm3439_vm5, %v330_v59, 0.0  ;;  %v344_v46 = vsel %vm3440_vm15, %v330_v59, 0.0  ;;  %v343_v1 = vsel %vm3441_vm11, %v330_v59, 0.0 }
 0x15e   :  { %353 = vadd.xlane.f32.xlu1 %v334_v0  ;;  %351 = vadd.xlane.f32.xlu0 %v333_v40  ;;  %v346_v17 = vsel %vm3442_vm14, %v330_v59, 0.0  ;;  %v345_v19 = vsel %vm3443_vm9, %v330_v59, 0.0  ;;  %v433_v21 = vsel %vm3444_vm7, %v330_v59, 0.0  ;;  %v432_v23 = vsel %vm3445_vm8, %v330_v59, 0.0 }
 0x15f   :  { %v435_v25 = vsel %vm3446_vm10, %v330_v59, 0.0  ;;  %vm3447_vm0 = vcmp.lt.s32.totalorder %v1649_v2, %v1656_v4  ;;  %vm3448_vm2 = vcmp.lt.s32.totalorder %v1649_v2, %v1678_v9  ;;  %vm3449_vm1 = vcmp.lt.s32.totalorder %v1649_v2, %v1669_v8 }
 0x160   :  { %v434_v48 = vsel %vm3447_vm0, %v330_v59, 0.0  ;;  %v437_v50 = vsel %vm3448_vm2, %v330_v59, 0.0  ;;  %v436_v27 = vsel %vm3449_vm1, %v330_v59, 0.0  ;;  %vm3450_vm3 = vcmp.lt.s32.totalorder %v1649_v2, %v1700_v14 }
 0x161   :  { %v439_v29 = vsel %vm3450_vm3, %v330_v59, 0.0  ;;  %vm3451_vm4 = vcmp.lt.s32.totalorder %v1649_v2, %v1691_v12  ;;  %vm3452_vm5 = vcmp.lt.s32.totalorder %v1649_v2, %v1718_v18  ;;  %vm3453_vm15 = vcmp.lt.s32.totalorder %v1649_v2, %v1709_v16 }
 0x162   :  { %357 = vadd.xlane.f32.xlu1 %v336_v42  ;;  %355 = vadd.xlane.f32.xlu0 %v335_v61  ;;  %v438_v31 = vsel %vm3451_vm4, %v330_v59, 0.0  ;;  %v441_v32 = vsel %vm3452_vm5, %v330_v59, 0.0  ;;  %v440_v33 = vsel %vm3453_vm15, %v330_v59, 0.0  ;;  %vm3454_vm11 = vcmp.lt.s32.totalorder %v1649_v2, %v1736_v22 }
 0x163   :  { %v443_v34 = vsel %vm3454_vm11, %v330_v59, 0.0  ;;  %vm3455_vm14 = vcmp.lt.s32.totalorder %v1649_v2, %v1727_v20  ;;  %vm3456_vm9 = vcmp.lt.s32.totalorder %v1649_v2, %v1754_v26  ;;  %vm3457_vm7 = vcmp.lt.s32.totalorder %v1649_v2, %v1745_v24 }
 0x164   :  { %v442_v52 = vsel %vm3455_vm14, %v330_v59, 0.0  ;;  %v445_v54 = vsel %vm3456_vm9, %v330_v59, 0.0  ;;  %v444_v39 = vsel %vm3457_vm7, %v330_v59, 0.0  ;;  %v447_v41 = vsel %vm146_vm12, %v330_v59, 0.0 }
 0x165   :  { %v446_v43 = vsel %vm145_vm6, %v330_v59, 0.0  ;;  %v1547_v59 = vadd.f32 -1.0, %v531_v37  ;;  %v513_v62 = vcvt.s32.f32 %v497_v36  ;;  %v512_v38 = vcvt.s32.f32 %v496_v49 }
 0x166   :  { %361 = vadd.xlane.f32.xlu1 %v338_v63  ;;  %359 = vadd.xlane.f32.xlu0 %v337_v7  ;;  %v498_v0 = vadd.s32 1, %v482_v51  ;;  %v530_v40 = vcvt.s32.f32 %v1656_v4  ;;  %v2153_v42 = vmul.f32 %v2148_v53, %v1987_v13  ;;  %v579_v61 = vmul.f32 %v1545_v55, %v529_v56 }
 0x167   :  { %v515_v63 = vcvt.s32.f32 %v499_v57  ;;  %vm380_vm6 = vcmp.le.s32.totalorder %v1659_v5, %v1649_v2  ;;  %vm3424_vm12 = vcmp.le.s32.totalorder %v1651_v3, %v1649_v2  ;;  %v578_v7 = vmul.f32 %v1544_v60, %v528_v58 }
 0x168   :  { %vm382_vm8 = vcmp.le.s32.totalorder %v1662_v6, %v1649_v2  ;;  %vm381_vm10 = vcmp.le.s32.totalorder %v1656_v4, %v1649_v2  ;;  %vm384_vm0 = vcmp.le.s32.totalorder %v1678_v9, %v1649_v2  ;;  %vm383_vm2 = vcmp.le.s32.totalorder %v1669_v8, %v1649_v2 }
 0x169   :  { %vm385_vm1 = vcmp.le.s32.totalorder %v1691_v12, %v1649_v2  ;;  %vm3408_vm3 = vcmp.le.s32.totalorder %v1700_v14, %v1649_v2  ;;  %v544_v56 = vmul.f32 16.0, %v512_v38  ;;  %v547_v47 = vmul.f32 16.0, %v515_v63 }
 0x16a   :  { %365 = vadd.xlane.f32.xlu1 %v340_v10  ;;  %363 = vadd.xlane.f32.xlu0 %v339_v11  ;;  %v581_v10 = vmul.f32 %v1547_v59, %v531_v37  ;;  %v691_v11 = vmax.f32 %v513_v62, 1.0  ;;  %vm3425_vm4 = vcmp.le.s32.totalorder %v1709_v16, %v1649_v2  ;;  %v532_v57 = vcvt.s32.f32 %v1669_v8 }
 0x16b   :  { %vm388_vm5 = vcmp.le.s32.totalorder %v1718_v18, %v1649_v2  ;;  %vm389_vm15 = vcmp.le.s32.totalorder %v1727_v20, %v1649_v2  ;;  %vm390_vm11 = vcmp.le.s32.totalorder %v1736_v22, %v1649_v2  ;;  %vm391_vm14 = vcmp.le.s32.totalorder %v1745_v24, %v1649_v2 }
 0x16c   :  { %1569 = vrcp.f32 %v691_v11  ;;  %vm3422_vm9 = vcmp.le.s32.totalorder %v1754_v26, %v1649_v2  ;;  %vm3426_vm7 = vcmp.le.s32.totalorder %v1763_v28, %v1649_v2 }
 0x16e   :  { %369 = vadd.xlane.f32.xlu1 %v342_v15  ;;  %367 = vadd.xlane.f32.xlu0 %v341_v44  ;;  %v533_v15 = vcvt.s32.f32 %v1678_v9  ;;  %v690_v44 = vmax.f32 %v512_v38, 1.0 }
 0x170   :  { %1571 = vrcp.f32 %v690_v44 }
 0x172   :  { %373 = vadd.xlane.f32.xlu1 %v344_v46  ;;  %371 = vadd.xlane.f32.xlu0 %v343_v1  ;;  %v514_v46 = vcvt.s32.f32 %v498_v0  ;;  %v1546_v1 = vadd.f32 -1.0, %v530_v40 }
 0x174   :  { %v2192_v51 = vmul.f32 16.0, %v514_v46 }
 0x176   :  { %377 = vadd.xlane.f32.xlu1 %v346_v17  ;;  %375 = vadd.xlane.f32.xlu0 %v345_v19  ;;  %v485_v17 = vsub.s32 %v1649_v2, %v1678_v9 }
 0x17a   :  { %450 = vadd.xlane.f32.xlu1 %v433_v21  ;;  %448 = vadd.xlane.f32.xlu0 %v432_v23  ;;  %v595_v23 = vsub.f32 %v2153_v42, %v579_v61 }
 0x17c   :  { %v611_v35 = vmul.f32 0.5, %v595_v23 }
 0x17e   :  { %454 = vadd.xlane.f32.xlu1 %v435_v25  ;;  %452 = vadd.xlane.f32.xlu0 %v434_v48  ;;  %v693_v25 = vmax.f32 %v515_v63, 1.0  ;;  %v484_v48 = vsub.s32 %v1649_v2, %v1669_v8 }
 0x180   :  { %1573 = vrcp.f32 %v693_v25  ;;  %v500_v63 = vadd.s32 1, %v484_v48  ;;  %v534_v48 = vcvt.s32.f32 %v1691_v12 }
 0x182   :  { %458 = vadd.xlane.f32.xlu1 %v437_v50  ;;  %456 = vadd.xlane.f32.xlu0 %v436_v27 }
 0x186   :  { %462 = vadd.xlane.f32.xlu1 %v439_v29  ;;  %460 = vadd.xlane.f32.xlu0 %v438_v31  ;;  %v594_v29 = vsub.f32 %v2153_v42, %v578_v7  ;;  %v597_v31 = vsub.f32 %v2153_v42, %v581_v10  ;;  %v535_v7 = vcvt.s32.f32 %v1700_v14 }
 0x188   :  { %v610_v37 = vmul.f32 0.5, %v594_v29  ;;  %v613_v36 = vmul.f32 0.5, %v597_v31 }
 0x18a   :  { %466 = vadd.xlane.f32.xlu1 %v441_v32  ;;  %464 = vadd.xlane.f32.xlu0 %v440_v33  ;;  %v545_v32 = vmul.f32 16.0, %v513_v62  ;;  %v1549_v33 = vadd.f32 -1.0, %v533_v15  ;;  %v626_v11 = vsub.f32 %v544_v56, %v610_v37 }
 0x18c   :  { %v583_v55 = vmul.f32 %v1549_v33, %v533_v15  ;;  %v627_v61 = vsub.f32 %v545_v32, %v611_v35  ;;  %v629_v15 = vsub.f32 %v547_v47, %v613_v36  ;;  %v516_v33 = vcvt.s32.f32 %v500_v63 }
 0x18d   :  { %v537_v63 = vcvt.s32.f32 %v1718_v18 }
 0x18e   :  { %470 = vadd.xlane.f32.xlu1 %v443_v34  ;;  %468 = vadd.xlane.f32.xlu0 %v442_v52  ;;  %v487_v34 = vsub.s32 %v1649_v2, %v1700_v14  ;;  %v580_v52 = vmul.f32 %v1546_v1, %v530_v40  ;;  %v2218_v32 = vmul.f32 10.0, %v627_v61  ;;  %v2231_v35 = vmul.f32 10.0, %v629_v15 }
 0x190   :  { %v596_v59 = vsub.f32 %v2153_v42, %v580_v52  ;;  %v503_v44 = vadd.s32 1, %v487_v34  ;;  %v1551_v34 = vadd.f32 -1.0, %v535_v7 }
 0x192   :  { %474 = vadd.xlane.f32.xlu1 %v445_v54  ;;  %472 = vadd.xlane.f32.xlu0 %v444_v39  ;;  %v692_v54 = vmax.f32 %v514_v46, 1.0  ;;  %v501_v39 = vadd.s32 1, %v485_v17  ;;  %v599_v17 = vsub.f32 %v2153_v42, %v583_v55  ;;  %v612_v23 = vmul.f32 0.5, %v596_v59 }
 0x194   :  { %1575 = vrcp.f32 %v692_v54  ;;  %v517_v62 = vcvt.s32.f32 %v501_v39  ;;  %v2225_v39 = vmul.f32 10.0, %v626_v11  ;;  %v615_v56 = vmul.f32 0.5, %v599_v17 }
 0x195   :  { %v628_v36 = vsub.f32 %v2192_v51, %v612_v23 }
 0x196   :  { %478 = vadd.xlane.f32.xlu1 %v447_v41  ;;  %476 = vadd.xlane.f32.xlu0 %v446_v43  ;;  %v2207_v1 = vmul.f32 16.0, %v517_v62  ;;  %v695_v25 = vmax.f32 %v517_v62, 1.0  ;;  %v2241_v62 = vmul.f32 16.0, %v516_v33 }
 0x198   :  { %1577 = vrcp.f32 %v695_v25  ;;  %v631_v11 = vsub.f32 %v2207_v1, %v615_v56 }
 0x1e7   :  { %v350_v19 = vpop.xlane.xlu1 %349  ;;  %v348_v21 = vpop.xlane.xlu0 %347 }
 0x1e8   :  { %v396_v50 = vsel %vm380_vm6, %v350_v19, 0.0  ;;  %v395_v27 = vsel %vm3424_vm12, %v348_v21, 0.0  ;;  %v1548_v19 = vadd.f32 -1.0, %v532_v57 }
 0x1e9   :  { %v411_v41 = vadd.f32 %v396_v50, %v395_v27  ;;  %v2214_v50 = vpop.eup %1569 }
 0x1ea   :  { %v2220_v52 = vpop.eup %1571  ;;  %v582_v47 = vmul.f32 %v1548_v19, %v532_v57  ;;  %v585_v57 = vmul.f32 %v1551_v34, %v535_v7  ;;  %v489_v7 = vsub.s32 %v1649_v2, %v1718_v18  ;;  %v536_v19 = vcvt.s32.f32 %v1709_v16 }
 0x1eb   :  { %v354_v43 = vpop.xlane.xlu1 %353  ;;  %v352_v45 = vpop.xlane.xlu0 %351  ;;  %v2267_v34 = vmul.f32 10.0, %v631_v11  ;;  %v494_v18 = vsub.s32 %v1649_v2, %v1763_v28 }
 0x1ec   :  { %v397_v58 = vsel %vm381_vm10, %v352_v45, 0.0  ;;  %v398_v60 = vsel %vm382_vm8, %v354_v43, 0.0  ;;  %v486_v43 = vsub.s32 %v1649_v2, %v1691_v12  ;;  %v598_v15 = vsub.f32 %v2153_v42, %v582_v47 }
 0x1ed   :  { %v412_v49 = vadd.f32 %v411_v41, %v397_v58  ;;  %v519_v41 = vcvt.s32.f32 %v503_v44  ;;  %v2233_v58 = vpop.eup %1573  ;;  %v1552_v56 = vadd.f32 -1.0, %v536_v19  ;;  %v539_v47 = vcvt.s32.f32 %v1736_v22 }
 0x1ee   :  { %v502_v51 = vadd.s32 1, %v486_v43  ;;  %v505_v43 = vadd.s32 1, %v489_v7  ;;  %v491_v7 = vsub.s32 %v1649_v2, %v1736_v22 }
 0x1ef   :  { %v358_v38 = vpop.xlane.xlu1 %357  ;;  %v413_v0 = vadd.f32 %v412_v49, %v398_v60  ;;  %v356_v40 = vpop.xlane.xlu0 %355  ;;  %v1550_v49 = vadd.f32 -1.0, %v534_v48  ;;  %v697_v61 = vmax.f32 %v519_v41, 1.0  ;;  %v551_v1 = vmul.f32 16.0, %v519_v41 }
 0x1f0   :  { %v399_v10 = vsel %vm383_vm2, %v356_v40, 0.0  ;;  %v400_v21 = vsel %vm384_vm0, %v358_v38, 0.0  ;;  %v694_v38 = vmax.f32 %v516_v33, 1.0  ;;  %v1553_v33 = vadd.f32 -1.0, %v537_v63 }
 0x1f1   :  { %v414_v46 = vadd.f32 %v413_v0, %v399_v10  ;;  %v2243_v0 = vpop.eup %1575  ;;  %v584_v17 = vmul.f32 %v1550_v49, %v534_v48 }
 0x1f2   :  { %1579 = vrcp.f32 %v694_v38  ;;  %v2277_v38 = vpop.eup %1577 }
 0x1f3   :  { %v362_v27 = vpop.xlane.xlu1 %361  ;;  %v415_v29 = vadd.f32 %v414_v46, %v400_v21  ;;  %v360_v31 = vpop.xlane.xlu0 %359  ;;  %v2258_v46 = vmul.f32 10.0, %v628_v36  ;;  %1581 = vrcp.f32 %v697_v61  ;;  %v600_v41 = vsub.f32 %v2153_v42, %v584_v17 }
 0x1f4   :  { %v401_v54 = vsel %vm385_vm1, %v360_v31, 0.0  ;;  %v402_v37 = vsel %vm3408_vm3, %v362_v27, 0.0  ;;  %vm3421_vm3 = vcmp.le.s32.totalorder %v1772_v30, %v1649_v2  ;;  %v601_v27 = vsub.f32 %v2153_v42, %v585_v57 }
 0x1f5   :  { %v416_v45 = vadd.f32 %v415_v29, %v401_v54  ;;  %v518_v31 = vcvt.s32.f32 %v502_v51  ;;  %v614_v54 = vmul.f32 0.5, %v598_v15  ;;  %v587_v61 = vmul.f32 %v1553_v33, %v537_v63 }
 0x1f6   :  { %v488_v51 = vsub.s32 %v1649_v2, %v1709_v16  ;;  %v521_v15 = vcvt.s32.f32 %v505_v43  ;;  %v2290_v17 = vmul.f32 0.5, %v600_v41 }
 0x1f7   :  { %v366_v55 = vpop.xlane.xlu1 %365  ;;  %v417_v60 = vadd.f32 %v416_v45, %v402_v37  ;;  %v364_v59 = vpop.xlane.xlu0 %363  ;;  %v630_v11 = vsub.f32 %v2241_v62, %v614_v54 }
 0x1f8   :  { %v403_v40 = vsel %vm3425_vm4, %v364_v59, 0.0  ;;  %v404_v44 = vsel %vm388_vm5, %v366_v55, 0.0  ;;  %v617_v55 = vmul.f32 0.5, %v601_v27  ;;  %v538_v59 = vcvt.s32.f32 %v1727_v20 }
 0x1f9   :  { %v418_v10 = vadd.f32 %v417_v60, %v403_v40  ;;  %v2274_v60 = vmul.f32 16.0, %v518_v31  ;;  %v696_v40 = vmax.f32 %v518_v31, 1.0  ;;  %v490_v31 = vsub.s32 %v1649_v2, %v1727_v20 }
 0x1fa   :  { %v1554_v62 = vadd.f32 -1.0, %v538_v59  ;;  %v504_v54 = vadd.s32 1, %v488_v51  ;;  %v699_v41 = vmax.f32 %v521_v15, 1.0 }
 0x1fb   :  { %v370_v21 = vpop.xlane.xlu1 %369  ;;  %v419_v23 = vadd.f32 %v418_v10, %v404_v44  ;;  %v368_v25 = vpop.xlane.xlu0 %367  ;;  %1583 = vrcp.f32 %v696_v40  ;;  %v632_v51 = vsub.f32 %v2274_v60, %v2290_v17  ;;  %v541_v60 = vcvt.s32.f32 %v1754_v26 }
 0x1fc   :  { %v405_v29 = vsel %vm389_vm15, %v368_v25, 0.0  ;;  %v406_v45 = vsel %vm390_vm11, %v370_v21, 0.0  ;;  %v586_v21 = vmul.f32 %v1552_v56, %v536_v19  ;;  %v2298_v43 = vpop.eup %1579  ;;  %v507_v56 = vadd.s32 1, %v491_v7 }
 0x1fd   :  { %v420_v48 = vadd.f32 %v419_v23, %v405_v29  ;;  %v1555_v23 = vadd.f32 -1.0, %v539_v47  ;;  %v633_v29 = vsub.f32 %v551_v1, %v617_v55  ;;  %1585 = vrcp.f32 %v699_v41 }
 0x1fe   :  { %v1557_v13 = vadd.f32 -1.0, %v541_v60 }
 0x1ff   :  { %v374_v37 = vpop.xlane.xlu1 %373  ;;  %v421_v36 = vadd.f32 %v420_v48, %v406_v45  ;;  %v372_v49 = vpop.xlane.xlu0 %371  ;;  %v603_v48 = vsub.f32 %v2153_v42, %v587_v61  ;;  %v553_v45 = vmul.f32 16.0, %v521_v15  ;;  %v589_v55 = vmul.f32 %v1555_v23, %v539_v47 }
 0x200   :  { %v407_v57 = vsel %vm391_vm14, %v372_v49, 0.0  ;;  %v408_v44 = vsel %vm3422_vm9, %v374_v37, 0.0  ;;  %v2300_v37 = vpop.eup %1581  ;;  %v602_v49 = vsub.f32 %v2153_v42, %v586_v21  ;;  %v588_v15 = vmul.f32 %v1554_v62, %v538_v59  ;;  %vm2390_vm9 = vmand %vm3424_vm12, %vm329_vm13 }
 0x201   :  { %v422_v10 = vadd.f32 %v421_v36, %v407_v57  ;;  %v2305_v36 = vmul.f32 10.0, %v630_v11  ;;  %v2314_v7 = vmul.f32 10.0, %v633_v29  ;;  %v540_v11 = vcvt.s32.f32 %v1745_v24  ;;  %vm2419_vm12 = vmand %vm381_vm10, %vm329_vm13 }
 0x202   :  { %v523_v21 = vcvt.s32.f32 %v507_v56  ;;  %v493_v47 = vsub.s32 %v1649_v2, %v1754_v26  ;;  %v604_v62 = vsub.f32 %v2153_v42, %v588_v15 }
 0x203   :  { %v378_v25 = vpop.xlane.xlu1 %377  ;;  %v423_v63 = vadd.f32 %v422_v10, %v408_v44  ;;  %v376_v27 = vpop.xlane.xlu0 %375  ;;  %v506_v10 = vadd.s32 1, %v490_v31  ;;  %v619_v44 = vmul.f32 0.5, %v603_v48  ;;  %v492_v48 = vsub.s32 %v1649_v2, %v1745_v24 }
 0x204   :  { %v409_v33 = vsel %vm3426_vm7, %v376_v27, 0.0  ;;  %v410_v1 = vsel %vm3421_vm3, %v378_v25, 0.0  ;;  %v618_v27 = vmul.f32 0.5, %v602_v49  ;;  %v2326_v41 = vmul.f32 16.0, %v523_v21  ;;  %vm2380_vm3 = vmand %vm380_vm6, %vm329_vm13 }
 0x205   :  { %v424_v19 = vadd.f32 %v423_v63, %v409_v33  ;;  %v520_v63 = vcvt.s32.f32 %v504_v54  ;;  %v605_v33 = vsub.f32 %v2153_v42, %v589_v55  ;;  %v522_v31 = vcvt.s32.f32 %v506_v10 }
 0x206   :  { %v635_v54 = vsub.f32 %v553_v45, %v619_v44  ;;  %v1556_v56 = vadd.f32 -1.0, %v540_v11  ;;  %v701_v49 = vmax.f32 %v523_v21, 1.0  ;;  %v2328_v55 = vadd.s32 1, %v493_v47 }
 0x207   :  { %v425_v57 = vadd.f32 %v424_v19, %v410_v1  ;;  %v2308_v40 = vpop.xlane.xlu1 %450  ;;  %v2310_v61 = vpop.xlane.xlu0 %448  ;;  %v552_v23 = vmul.f32 16.0, %v520_v63  ;;  %v698_v19 = vmax.f32 %v520_v63, 1.0  ;;  %v2333_v10 = vmul.f32 0.5, %v605_v33 }
 0x208   :  { %v2335_v15 = vmul.f32 16.0, %v522_v31  ;;  %v620_v63 = vmul.f32 0.5, %v604_v62  ;;  %v700_v22 = vmax.f32 %v522_v31, 1.0  ;;  %v508_v24 = vadd.s32 1, %v492_v48 }
 0x209   :  { %v426_v25 = vrot.slane %v425_v57, 4  ;;  %v634_v53 = vsub.f32 %v552_v23, %v618_v27  ;;  %v648_v21 = vmul.f32 10.0, %v632_v51  ;;  %1587 = vrcp.f32 %v698_v19 }
 0x20a   :  { %v590_v47 = vmul.f32 %v1556_v56, %v540_v11  ;;  %v2341_v23 = vmul.f32 10.0, %v635_v54  ;;  %1589 = vrcp.f32 %v701_v49  ;;  %v2348_v31 = vmul.f32 %v1557_v13, %v541_v60 }
 0x20b   :  { %v427_v17 = vadd.f32 %v426_v25, %v425_v57  ;;  %v2321_v59 = vpop.xlane.xlu1 %454  ;;  %v453_v29 = vpop.xlane.xlu0 %452  ;;  %v542_v57 = vcvt.s32.f32 %v1763_v28  ;;  %v2343_v33 = vmul.f32 10.0, %v634_v53  ;;  %v636_v19 = vsub.f32 %v2335_v15, %v620_v63 }
 0x20c   :  { %v2331_v25 = vpop.eup %1583  ;;  %1591 = vrcp.f32 %v700_v22  ;;  %v524_v54 = vcvt.s32.f32 %v508_v24  ;;  %v606_v53 = vsub.f32 %v2153_v42, %v590_v47  ;;  %v543_v49 = vcvt.s32.f32 %v1772_v30 }
 0x20d   :  { %v428_v1 = vrot.slane %v427_v17, 2  ;;  %v1558_v27 = vadd.f32 -1.0, %v542_v57  ;;  %v2350_v51 = vpop.eup %1585  ;;  %v510_v13 = vadd.s32 1, %v494_v18  ;;  %v607_v47 = vsub.f32 %v2153_v42, %v2348_v31 }
 0x20f   :  { %v429_v26 = vadd.f32 %v428_v1, %v427_v17  ;;  %v2337_v45 = vpop.xlane.xlu1 %458  ;;  %v457_v44 = vpop.xlane.xlu0 %456  ;;  %v495_v1 = vsub.s32 %v1649_v2, %v1772_v30  ;;  %v592_v22 = vmul.f32 %v1558_v27, %v542_v57 }
 0x211   :  { %v430_v20 = vrot.slane %v429_v26, 1 }
 0x213   :  { %v2352_v11 = vadd.f32 %v430_v20, %v429_v26  ;;  %v461_v48 = vpop.xlane.xlu0 %460  ;;  %v2355_v56 = vpop.xlane.xlu1 %462 }
 0x215   :  { %v659_v60 = vsub.f32 %v2352_v11, %v2308_v40  ;;  %v658_v20 = vsub.f32 %v2352_v11, %v2310_v61  ;;  %v660_v26 = vsub.f32 %v2352_v11, %v453_v29  ;;  %v661_v24 = vsub.f32 %v2352_v11, %v2321_v59 }
 0x216   :  { %v662_v15 = vsub.f32 %v2352_v11, %v457_v44  ;;  %v664_v63 = vsub.f32 %v2352_v11, %v461_v48  ;;  %v556_v29 = vmul.f32 16.0, %v524_v54  ;;  %v1559_v44 = vadd.f32 -1.0, %v543_v49 }
 0x217   :  { %v675_v18 = vadd.f32 %v659_v60, %v2218_v32  ;;  %v674_v40 = vadd.f32 %v658_v20, %v2225_v39  ;;  %v676_v17 = vadd.f32 %v660_v26, %v2258_v46  ;;  %v465_v61 = vpop.xlane.xlu0 %464  ;;  %v622_v39 = vmul.f32 0.5, %v606_v53  ;;  %v2400_v62 = vpop.xlane.xlu1 %466 }
 0x218   :  { %v678_v57 = vadd.f32 %v662_v15, %v2305_v36  ;;  %v702_v46 = vmax.f32 %v524_v54, 1.0  ;;  %v526_v48 = vcvt.s32.f32 %v510_v13  ;;  %v608_v60 = vsub.f32 %v2153_v42, %v592_v22  ;;  %v1588_v36 = vpop.eup %1587 }
 0x219   :  { %v709_v27 = vmul.f32 %v2214_v50, %v675_v18  ;;  %v707_v31 = vmul.f32 %v2220_v52, %v674_v40  ;;  %v677_v20 = vadd.f32 %v661_v24, %v2231_v35  ;;  %v663_v26 = vsub.f32 %v2352_v11, %v2337_v45  ;;  %v2403_v54 = vpop.eup %1589 }
 0x21a   :  { %v680_v15 = vadd.f32 %v664_v63, %v648_v21  ;;  %v666_v53 = vsub.f32 %v2352_v11, %v465_v61  ;;  %v711_v35 = vmul.f32 %v2243_v0, %v676_v17  ;;  %v715_v21 = vmul.f32 %v2298_v43, %v678_v57 }
 0x21b   :  { %v469_v3 = vpop.xlane.xlu0 %468  ;;  %v2407_v50 = vsel %vm2380_vm3, %v709_v27, -1e+30  ;;  %v2411_v52 = vsel %vm2390_vm9, %v707_v31, -1e+30  ;;  %v652_v13 = vmul.f32 10.0, %v636_v19  ;;  %1593 = vrcp.f32 %v702_v46  ;;  %vm2433_vm3 = vmand %vm383_vm2, %vm329_vm13  ;;  %v1592_v19 = vpop.eup %1591 }
 0x21c   :  { %788 = vrot.lane.b32.xlu1 %v2407_v50, %s1626_s0  ;;  %786 = vrot.lane.b32.xlu0 %v2411_v52, %s1626_s0  ;;  %v511_v17 = vadd.s32 1, %v495_v1  ;;  %v593_v43 = vmul.f32 %v1559_v44, %v543_v49  ;;  %v638_v22 = vsub.f32 %v556_v29, %v622_v39  ;;  %v558_v24 = vmul.f32 16.0, %v526_v48  ;;  %vm741_vm9 = vmand %vm382_vm8, %vm329_vm13 }
 0x21d   :  { %v624_v63 = vmul.f32 0.5, %v608_v60  ;;  %v704_v18 = vmax.f32 %v526_v48, 1.0  ;;  %v679_v40 = vadd.f32 %v663_v26, %v2267_v34  ;;  %v665_v61 = vsub.f32 %v2352_v11, %v2355_v56 }
 0x21e   :  { %v713_v59 = vmul.f32 %v2233_v58, %v677_v20  ;;  %v719_v57 = vmul.f32 %v2331_v25, %v680_v15  ;;  %v682_v32 = vadd.f32 %v666_v53, %v2343_v33  ;;  %v668_v46 = vsub.f32 %v2352_v11, %v469_v3  ;;  %v471_v58 = vpop.xlane.xlu1 %470 }
 0x21f   :  { %v473_v1 = vpop.xlane.xlu0 %472  ;;  %v2446_v49 = vsel %vm2419_vm12, %v711_v35, -1e+30  ;;  %v2450_v29 = vsel %vm2433_vm3, %v715_v21, -1e+30  ;;  %v3467_v34 = vcvt.s32.f32 %v2328_v55  ;;  %v623_v3 = vmul.f32 0.5, %v607_v47  ;;  %vm744_vm12 = vmand %vm385_vm1, %vm329_vm13 }
 0x220   :  { %790 = vrot.lane.b32.xlu1 %v2446_v49, %s1626_s0  ;;  %794 = vrot.lane.b32.xlu0 %v2450_v29, %s1626_s0  ;;  %v527_v39 = vcvt.s32.f32 %v511_v17  ;;  %v654_v44 = vmul.f32 10.0, %v638_v22  ;;  %v609_v27 = vsub.f32 %v2153_v42, %v593_v43  ;;  %v640_v47 = vsub.f32 %v558_v24, %v624_v63  ;;  %vm2485_vm3 = vmand %vm384_vm0, %vm329_vm13 }
 0x221   :  { %v557_v25 = vmul.f32 16.0, %v3467_v34  ;;  %v3468_v33 = vmov %v3467_v34  ;;  %1595 = vrcp.f32 %v704_v18  ;;  %v681_v55 = vadd.f32 %v665_v61, %v2314_v7 }
 0x222   :  { %v703_v56 = vmax.f32 %v3468_v33, 1.0  ;;  %v667_v31 = vsub.f32 %v2352_v11, %v2400_v62  ;;  %v2474_v48 = vsel %vm741_vm9, %v713_v59, -1e+30  ;;  %v717_v60 = vmul.f32 %v2277_v38, %v679_v40  ;;  %vm746_vm9 = vmand %vm3425_vm4, %vm329_vm13  ;;  %v475_v17 = vpop.xlane.xlu1 %474 }
 0x223   :  { %v684_v20 = vadd.f32 %v668_v46, %v652_v13  ;;  %v670_v26 = vsub.f32 %v2352_v11, %v473_v1  ;;  %v2478_v15 = vsel %vm744_vm12, %v719_v57, -1e+30  ;;  %v723_v7 = vmul.f32 %v1588_v36, %v682_v32  ;;  %v477_v35 = vpop.xlane.xlu0 %476 }
 0x224   :  { %v3471_v62 = vsub.f32 %v2326_v41, %v2333_v10  ;;  %v639_v38 = vsub.f32 %v557_v25, %v623_v3  ;;  %1597 = vrcp.f32 %v703_v56  ;;  %792 = vrot.lane.b32.xlu1 %v2474_v48, %s1626_s0  ;;  %798 = vrot.lane.b32.xlu0 %v2478_v15, %s1626_s0  ;;  %v559_v36 = vmul.f32 16.0, %v527_v39 }
 0x225   :  { %v625_v45 = vmul.f32 0.5, %v609_v27  ;;  %v705_v21 = vmax.f32 %v527_v39, 1.0  ;;  %v656_v41 = vmul.f32 10.0, %v640_v47  ;;  %v1594_v10 = vpop.eup %1593  ;;  %v683_v13 = vadd.f32 %v667_v31, %v2341_v23 }
 0x226   :  { %v653_v53 = vmul.f32 10.0, %v3471_v62  ;;  %v669_v0 = vsub.f32 %v2352_v11, %v471_v58  ;;  %v2505_v43 = vsel %vm2485_vm3, %v717_v60, -1e+30  ;;  %v721_v22 = vmul.f32 %v2300_v37, %v681_v55  ;;  %vm748_vm3 = vmand %vm389_vm15, %vm329_vm13  ;;  %v479_v3 = vpop.xlane.xlu1 %478 }
 0x227   :  { %v686_v24 = vadd.f32 %v670_v26, %v654_v44  ;;  %v672_v63 = vsub.f32 %v2352_v11, %v477_v35  ;;  %v2509_v18 = vsel %vm746_vm9, %v723_v7, -1e+30  ;;  %vm3472_vm12 = vcmp.le.s32.totalorder %v1700_v14, %v1649_v2  ;;  %vm747_vm9 = vmand %vm388_vm5, %vm329_vm13  ;;  %v3477_v7 = vld [vmem:[#allocation10_spill] sm:$0xff] }
 0x228   :  { %vm745_vm4 = vmand %vm3472_vm12, %vm329_vm13  ;;  %v727_v23 = vmul.f32 %v1592_v19, %v684_v20  ;;  %796 = vrot.lane.b32.xlu1 %v2505_v43, %s1626_s0  ;;  %802 = vrot.lane.b32.xlu0 %v2509_v18, %s1626_s0  ;;  %v655_v40 = vmul.f32 10.0, %v639_v38  ;;  %1599 = vrcp.f32 %v705_v21  ;;  %v685_v61 = vadd.f32 %v669_v0, %v653_v53 }
 0x229   :  { %v671_v59 = vsub.f32 %v2352_v11, %v475_v17  ;;  %v641_v57 = vsub.f32 %v559_v36, %v625_v45  ;;  %v725_v19 = vmul.f32 %v2350_v51, %v683_v13  ;;  %v688_v46 = vadd.f32 %v672_v63, %v656_v41  ;;  %vm749_vm12 = vmand %vm390_vm11, %vm329_vm13 }
 0x22a   :  { %v2527_v1 = vsel %vm745_vm4, %v721_v22, -1e+30  ;;  %v2529_v58 = vsel %vm748_vm3, %v727_v23, -1e+30  ;;  %v731_v25 = vmul.f32 %v1594_v10, %v686_v24  ;;  %vm750_vm4 = vmand %vm391_vm14, %vm329_vm13  ;;  %v729_v44 = vmul.f32 %v2403_v54, %v685_v61 }
 0x22b   :  { %v1596_v32 = vpop.eup %1595  ;;  %v657_v56 = vmul.f32 10.0, %v641_v57  ;;  %v2545_v39 = vsel %vm747_vm9, %v725_v19, -1e+30  ;;  %v687_v27 = vadd.f32 %v671_v59, %v655_v40  ;;  %v673_v47 = vsub.f32 %v2352_v11, %v479_v3  ;;  %vm752_vm3 = vmand %vm3426_vm7, %vm329_vm13 }
 0x22c   :  { %800 = vrot.lane.b32.xlu1 %v2527_v1, %s1626_s0  ;;  %806 = vrot.lane.b32.xlu0 %v2529_v58, %s1626_s0  ;;  %v2549_v55 = vsel %vm750_vm4, %v731_v25, -1e+30  ;;  %v735_v60 = vmul.f32 %v1596_v32, %v688_v46  ;;  %v2565_v20 = vsel %vm749_vm12, %v729_v44, -1e+30  ;;  %vm3478_vm9 = vcmp.le.s32.totalorder %v3477_v7, %v1649_v2 }
 0x22d   :  { %v689_v54 = vadd.f32 %v673_v47, %v657_v56  ;;  %vm751_vm4 = vmand %vm3478_vm9, %vm329_vm13  ;;  %vm3479_vm12 = vcmp.le.s32.totalorder %v1772_v30, %v1649_v2  ;;  %vm834_vm7 = vcmp.lt.s32.totalorder %v1649_v2, 127  ;;  %vm931_vm9 = vcmp.lt.s32.totalorder %v1649_v2, 126 }
 0x22e   :  { %v1598_v33 = vpop.eup %1597  ;;  %v2567_v26 = vsel %vm752_vm3, %v735_v60, -1e+30  ;;  %vm753_vm3 = vmand %vm3479_vm12, %vm329_vm13  ;;  %vm1222_vm12 = vcmp.lt.s32.totalorder %v1649_v2, 112 }
 0x22f   :  { %v733_v42 = vmul.f32 %v1598_v33, %v687_v27 }
 0x230   :  { %804 = vrot.lane.b32.xlu1 %v2545_v39, %s1626_s0  ;;  %810 = vrot.lane.b32.xlu0 %v2549_v55, %s1626_s0 }
 0x231   :  { %v2578_v62 = vsel %vm751_vm4, %v733_v42, -1e+30  ;;  %vm1125_vm4 = vcmp.lt.s32.totalorder %v1649_v2, 120 }
 0x232   :  { %v1600_v11 = vpop.eup %1599 }
 0x233   :  { %v737_v53 = vmul.f32 %v1600_v11, %v689_v54 }
 0x234   :  { %808 = vrot.lane.b32.xlu1 %v2565_v20, %s1626_s0  ;;  %814 = vrot.lane.b32.xlu0 %v2567_v26, %s1626_s0 }
 0x235   :  { %v2587_v38 = vsel %vm753_vm3, %v737_v53, -1e+30  ;;  %vm1319_vm3 = vcmp.lt.s32.totalorder %v1649_v2, 96 }
 0x238   :  { %812 = vrot.lane.b32.xlu1 %v2578_v62, %s1626_s0 }
 0x23c   :  { %816 = vrot.lane.b32.xlu1 %v2587_v38, %s1626_s0 }
 0x28e   :  { %v789_v35 = vpop.permute.xlu1 %788  ;;  %v787_v36 = vpop.permute.xlu0 %786 }
 0x28f   :  { %v836_v45 = vsel %vm834_vm7, %v789_v35, -1e+30  ;;  %v835_v21 = vsel %vm834_vm7, %v787_v36, -1e+30 }
 0x290   :  { %v2597_v41 = vmax.f32 %v2407_v50, %v836_v45  ;;  %v2600_v10 = vmax.f32 %v2411_v52, %v835_v21 }
 0x292   :  { %885 = vrot.lane.b32.xlu1 %v2597_v41, %s1627_s8  ;;  %v791_v13 = vpop.permute.xlu1 %790  ;;  %883 = vrot.lane.b32.xlu0 %v2600_v10, %s1627_s8  ;;  %v795_v0 = vpop.permute.xlu0 %794 }
 0x293   :  { %v837_v17 = vsel %vm834_vm7, %v791_v13, -1e+30  ;;  %v839_v50 = vsel %vm834_vm7, %v795_v0, -1e+30 }
 0x294   :  { %v2609_v22 = vmax.f32 %v2446_v49, %v837_v17  ;;  %v2618_v23 = vmax.f32 %v2450_v29, %v839_v50 }
 0x296   :  { %v793_v52 = vpop.permute.xlu1 %792  ;;  %887 = vrot.lane.b32.xlu0 %v2609_v22, %s1627_s8  ;;  %v799_v24 = vpop.permute.xlu0 %798 }
 0x297   :  { %v838_v63 = vsel %vm834_vm7, %v793_v52, -1e+30  ;;  %v841_v49 = vsel %vm834_vm7, %v799_v24, -1e+30 }
 0x298   :  { %v2621_v40 = vmax.f32 %v2474_v48, %v838_v63  ;;  %v2632_v29 = vmax.f32 %v2478_v15, %v841_v49 }
 0x29a   :  { %889 = vrot.lane.b32.xlu1 %v2621_v40, %s1627_s8  ;;  %v797_v61 = vpop.permute.xlu1 %796  ;;  %891 = vrot.lane.b32.xlu0 %v2618_v23, %s1627_s8  ;;  %v803_v59 = vpop.permute.xlu0 %802 }
 0x29b   :  { %v840_v57 = vsel %vm834_vm7, %v797_v61, -1e+30  ;;  %v843_v19 = vsel %vm834_vm7, %v803_v59, -1e+30 }
 0x29c   :  { %v2635_v48 = vmax.f32 %v2505_v43, %v840_v57  ;;  %v2646_v15 = vmax.f32 %v2509_v18, %v843_v19 }
 0x29e   :  { %893 = vrot.lane.b32.xlu1 %v2635_v48, %s1627_s8  ;;  %v801_v32 = vpop.permute.xlu1 %800  ;;  %895 = vrot.lane.b32.xlu0 %v2632_v29, %s1627_s8  ;;  %v807_v46 = vpop.permute.xlu0 %806 }
 0x29f   :  { %v842_v25 = vsel %vm834_vm7, %v801_v32, -1e+30  ;;  %v845_v3 = vsel %vm834_vm7, %v807_v46, -1e+30 }
 0x2a0   :  { %v2649_v43 = vmax.f32 %v2527_v1, %v842_v25  ;;  %v2660_v18 = vmax.f32 %v2529_v58, %v845_v3 }
 0x2a2   :  { %897 = vrot.lane.b32.xlu1 %v2649_v43, %s1627_s8  ;;  %v805_v33 = vpop.permute.xlu1 %804  ;;  %899 = vrot.lane.b32.xlu0 %v2646_v15, %s1627_s8  ;;  %v811_v56 = vpop.permute.xlu0 %810 }
 0x2a3   :  { %v844_v44 = vsel %vm834_vm7, %v805_v33, -1e+30  ;;  %v847_v27 = vsel %vm834_vm7, %v811_v56, -1e+30 }
 0x2a4   :  { %v2663_v1 = vmax.f32 %v2545_v39, %v844_v44  ;;  %v2674_v58 = vmax.f32 %v2549_v55, %v847_v27 }
 0x2a6   :  { %901 = vrot.lane.b32.xlu1 %v2663_v1, %s1627_s8  ;;  %v809_v47 = vpop.permute.xlu1 %808  ;;  %903 = vrot.lane.b32.xlu0 %v2660_v18, %s1627_s8  ;;  %v815_v60 = vpop.permute.xlu0 %814 }
 0x2a7   :  { %v846_v11 = vsel %vm834_vm7, %v809_v47, -1e+30  ;;  %v849_v54 = vsel %vm834_vm7, %v815_v60, -1e+30 }
 0x2a8   :  { %v2677_v39 = vmax.f32 %v2565_v20, %v846_v11  ;;  %v2688_v35 = vmax.f32 %v2567_v26, %v849_v54 }
 0x2aa   :  { %905 = vrot.lane.b32.xlu1 %v2677_v39, %s1627_s8  ;;  %v813_v42 = vpop.permute.xlu1 %812  ;;  %907 = vrot.lane.b32.xlu0 %v2674_v58, %s1627_s8 }
 0x2ab   :  { %v848_v53 = vsel %vm834_vm7, %v813_v42, -1e+30 }
 0x2ac   :  { %v2691_v55 = vmax.f32 %v2578_v62, %v848_v53 }
 0x2ae   :  { %909 = vrot.lane.b32.xlu1 %v2691_v55, %s1627_s8  ;;  %v817_v20 = vpop.permute.xlu1 %816  ;;  %911 = vrot.lane.b32.xlu0 %v2688_v35, %s1627_s8 }
 0x2af   :  { %v850_v36 = vsel %vm834_vm7, %v817_v20, -1e+30  ;;  %vm1028_vm7 = vcmp.lt.s32.totalorder %v1649_v2, 124 }
 0x2b0   :  { %v2700_v45 = vmax.f32 %v2587_v38, %v850_v36 }
 0x2b2   :  { %913 = vrot.lane.b32.xlu1 %v2700_v45, %s1627_s8 }
 0x304   :  { %v886_v26 = vpop.permute.xlu1 %885  ;;  %v884_v62 = vpop.permute.xlu0 %883 }
 0x305   :  { %v933_v21 = vsel %vm931_vm9, %v886_v26, -1e+30  ;;  %v932_v13 = vsel %vm931_vm9, %v884_v62, -1e+30 }
 0x306   :  { %v2710_v0 = vmax.f32 %v2597_v41, %v933_v21  ;;  %v2713_v17 = vmax.f32 %v2600_v10, %v932_v13 }
 0x308   :  { %982 = vrot.lane.b32.xlu1 %v2710_v0, %s1628_s9  ;;  %980 = vrot.lane.b32.xlu0 %v2713_v17, %s1628_s9  ;;  %v888_v38 = vpop.permute.xlu0 %887 }
 0x309   :  { %v934_v50 = vsel %vm931_vm9, %v888_v38, -1e+30 }
 0x30a   :  { %v2722_v52 = vmax.f32 %v2609_v22, %v934_v50 }
 0x30c   :  { %v890_v24 = vpop.permute.xlu1 %889  ;;  %984 = vrot.lane.b32.xlu0 %v2722_v52, %s1628_s9  ;;  %v892_v41 = vpop.permute.xlu0 %891 }
 0x30d   :  { %v935_v10 = vsel %vm931_vm9, %v890_v24, -1e+30  ;;  %v936_v63 = vsel %vm931_vm9, %v892_v41, -1e+30 }
 0x30e   :  { %v2731_v49 = vmax.f32 %v2621_v40, %v935_v10  ;;  %v2734_v61 = vmax.f32 %v2618_v23, %v936_v63 }
 0x310   :  { %986 = vrot.lane.b32.xlu1 %v2731_v49, %s1628_s9  ;;  %v894_v22 = vpop.permute.xlu1 %893  ;;  %988 = vrot.lane.b32.xlu0 %v2734_v61, %s1628_s9  ;;  %v896_v59 = vpop.permute.xlu0 %895 }
 0x311   :  { %v937_v57 = vsel %vm931_vm9, %v894_v22, -1e+30  ;;  %v938_v19 = vsel %vm931_vm9, %v896_v59, -1e+30 }
 0x312   :  { %v2745_v40 = vmax.f32 %v2635_v48, %v937_v57  ;;  %v2748_v23 = vmax.f32 %v2632_v29, %v938_v19 }
 0x314   :  { %990 = vrot.lane.b32.xlu1 %v2745_v40, %s1628_s9  ;;  %v898_v32 = vpop.permute.xlu1 %897  ;;  %992 = vrot.lane.b32.xlu0 %v2748_v23, %s1628_s9  ;;  %v900_v46 = vpop.permute.xlu0 %899 }
 0x315   :  { %v939_v25 = vsel %vm931_vm9, %v898_v32, -1e+30  ;;  %v940_v3 = vsel %vm931_vm9, %v900_v46, -1e+30 }
 0x316   :  { %v2759_v48 = vmax.f32 %v2649_v43, %v939_v25  ;;  %v2762_v29 = vmax.f32 %v2646_v15, %v940_v3 }
 0x318   :  { %994 = vrot.lane.b32.xlu1 %v2759_v48, %s1628_s9  ;;  %v902_v33 = vpop.permute.xlu1 %901  ;;  %996 = vrot.lane.b32.xlu0 %v2762_v29, %s1628_s9  ;;  %v904_v56 = vpop.permute.xlu0 %903 }
 0x319   :  { %v941_v44 = vsel %vm931_vm9, %v902_v33, -1e+30  ;;  %v942_v27 = vsel %vm931_vm9, %v904_v56, -1e+30 }
 0x31a   :  { %v2773_v43 = vmax.f32 %v2663_v1, %v941_v44  ;;  %v2776_v15 = vmax.f32 %v2660_v18, %v942_v27 }
 0x31c   :  { %998 = vrot.lane.b32.xlu1 %v2773_v43, %s1628_s9  ;;  %v906_v47 = vpop.permute.xlu1 %905  ;;  %1000 = vrot.lane.b32.xlu0 %v2776_v15, %s1628_s9  ;;  %v908_v60 = vpop.permute.xlu0 %907 }
 0x31d   :  { %v943_v11 = vsel %vm931_vm9, %v906_v47, -1e+30  ;;  %v944_v54 = vsel %vm931_vm9, %v908_v60, -1e+30 }
 0x31e   :  { %v2787_v1 = vmax.f32 %v2677_v39, %v943_v11  ;;  %v2790_v18 = vmax.f32 %v2674_v58, %v944_v54 }
 0x320   :  { %1002 = vrot.lane.b32.xlu1 %v2787_v1, %s1628_s9  ;;  %v910_v42 = vpop.permute.xlu1 %909  ;;  %1004 = vrot.lane.b32.xlu0 %v2790_v18, %s1628_s9  ;;  %v912_v53 = vpop.permute.xlu0 %911 }
 0x321   :  { %v945_v20 = vsel %vm931_vm9, %v910_v42, -1e+30  ;;  %v946_v36 = vsel %vm931_vm9, %v912_v53, -1e+30 }
 0x322   :  { %v2801_v39 = vmax.f32 %v2691_v55, %v945_v20  ;;  %v2804_v58 = vmax.f32 %v2688_v35, %v946_v36 }
 0x324   :  { %1006 = vrot.lane.b32.xlu1 %v2801_v39, %s1628_s9  ;;  %v914_v26 = vpop.permute.xlu1 %913  ;;  %1008 = vrot.lane.b32.xlu0 %v2804_v58, %s1628_s9 }
 0x325   :  { %v947_v62 = vsel %vm931_vm9, %v914_v26, -1e+30  ;;  %vm1416_vm9 = vcmp.lt.s32.totalorder %v1649_v2, 64 }
 0x326   :  { %v2813_v21 = vmax.f32 %v2700_v45, %v947_v62 }
 0x328   :  { %1010 = vrot.lane.b32.xlu1 %v2813_v21, %s1628_s9 }
 0x37a   :  { %v983_v35 = vpop.permute.xlu1 %982  ;;  %v981_v55 = vpop.permute.xlu0 %980 }
 0x37b   :  { %v1030_v13 = vsel %vm1028_vm7, %v983_v35, -1e+30  ;;  %v1029_v38 = vsel %vm1028_vm7, %v981_v55, -1e+30 }
 0x37c   :  { %v2823_v50 = vmax.f32 %v2710_v0, %v1030_v13  ;;  %v2826_v24 = vmax.f32 %v2713_v17, %v1029_v38 }
 0x37e   :  { %1079 = vrot.lane.b32.xlu1 %v2823_v50, %s1629_s10  ;;  %1077 = vrot.lane.b32.xlu0 %v2826_v24, %s1629_s10  ;;  %v985_v45 = vpop.permute.xlu0 %984 }
 0x37f   :  { %v1031_v41 = vsel %vm1028_vm7, %v985_v45, -1e+30 }
 0x380   :  { %v2835_v10 = vmax.f32 %v2722_v52, %v1031_v41 }
 0x382   :  { %v987_v63 = vpop.permute.xlu1 %986  ;;  %1081 = vrot.lane.b32.xlu0 %v2835_v10, %s1629_s10  ;;  %v989_v0 = vpop.permute.xlu0 %988 }
 0x383   :  { %v1032_v17 = vsel %vm1028_vm7, %v987_v63, -1e+30  ;;  %v1033_v22 = vsel %vm1028_vm7, %v989_v0, -1e+30 }
 0x384   :  { %v2844_v59 = vmax.f32 %v2731_v49, %v1032_v17  ;;  %v2847_v57 = vmax.f32 %v2734_v61, %v1033_v22 }
 0x386   :  { %1083 = vrot.lane.b32.xlu1 %v2844_v59, %s1629_s10  ;;  %v991_v52 = vpop.permute.xlu1 %990  ;;  %1085 = vrot.lane.b32.xlu0 %v2847_v57, %s1629_s10  ;;  %v993_v19 = vpop.permute.xlu0 %992 }
 0x387   :  { %v1034_v32 = vsel %vm1028_vm7, %v991_v52, -1e+30  ;;  %v1035_v46 = vsel %vm1028_vm7, %v993_v19, -1e+30 }
 0x388   :  { %v2858_v49 = vmax.f32 %v2745_v40, %v1034_v32  ;;  %v2861_v61 = vmax.f32 %v2748_v23, %v1035_v46 }
 0x38a   :  { %1087 = vrot.lane.b32.xlu1 %v2858_v49, %s1629_s10  ;;  %v995_v25 = vpop.permute.xlu1 %994  ;;  %1089 = vrot.lane.b32.xlu0 %v2861_v61, %s1629_s10  ;;  %v997_v3 = vpop.permute.xlu0 %996 }
 0x38b   :  { %v1036_v33 = vsel %vm1028_vm7, %v995_v25, -1e+30  ;;  %v1037_v56 = vsel %vm1028_vm7, %v997_v3, -1e+30 }
 0x38c   :  { %v2872_v40 = vmax.f32 %v2759_v48, %v1036_v33  ;;  %v2875_v23 = vmax.f32 %v2762_v29, %v1037_v56 }
 0x38e   :  { %1091 = vrot.lane.b32.xlu1 %v2872_v40, %s1629_s10  ;;  %v999_v44 = vpop.permute.xlu1 %998  ;;  %1093 = vrot.lane.b32.xlu0 %v2875_v23, %s1629_s10  ;;  %v1001_v27 = vpop.permute.xlu0 %1000 }
 0x38f   :  { %v1038_v47 = vsel %vm1028_vm7, %v999_v44, -1e+30  ;;  %v1039_v60 = vsel %vm1028_vm7, %v1001_v27, -1e+30 }
 0x390   :  { %v2886_v48 = vmax.f32 %v2773_v43, %v1038_v47  ;;  %v2889_v29 = vmax.f32 %v2776_v15, %v1039_v60 }
 0x392   :  { %1095 = vrot.lane.b32.xlu1 %v2886_v48, %s1629_s10  ;;  %v1003_v11 = vpop.permute.xlu1 %1002  ;;  %1097 = vrot.lane.b32.xlu0 %v2889_v29, %s1629_s10  ;;  %v1005_v54 = vpop.permute.xlu0 %1004 }
 0x393   :  { %v1040_v42 = vsel %vm1028_vm7, %v1003_v11, -1e+30  ;;  %v1041_v53 = vsel %vm1028_vm7, %v1005_v54, -1e+30 }
 0x394   :  { %v2900_v43 = vmax.f32 %v2787_v1, %v1040_v42  ;;  %v2903_v15 = vmax.f32 %v2790_v18, %v1041_v53 }
 0x396   :  { %1099 = vrot.lane.b32.xlu1 %v2900_v43, %s1629_s10  ;;  %v1007_v20 = vpop.permute.xlu1 %1006  ;;  %1101 = vrot.lane.b32.xlu0 %v2903_v15, %s1629_s10  ;;  %v1009_v36 = vpop.permute.xlu0 %1008 }
 0x397   :  { %v1042_v26 = vsel %vm1028_vm7, %v1007_v20, -1e+30  ;;  %v1043_v62 = vsel %vm1028_vm7, %v1009_v36, -1e+30 }
 0x398   :  { %v2914_v1 = vmax.f32 %v2801_v39, %v1042_v26  ;;  %v2917_v18 = vmax.f32 %v2804_v58, %v1043_v62 }
 0x39a   :  { %1103 = vrot.lane.b32.xlu1 %v2914_v1, %s1629_s10  ;;  %v1011_v35 = vpop.permute.xlu1 %1010  ;;  %1105 = vrot.lane.b32.xlu0 %v2917_v18, %s1629_s10 }
 0x39b   :  { %v1044_v55 = vsel %vm1028_vm7, %v1011_v35, -1e+30 }
 0x39c   :  { %v2926_v13 = vmax.f32 %v2813_v21, %v1044_v55 }
 0x39e   :  { %1107 = vrot.lane.b32.xlu1 %v2926_v13, %s1629_s10 }
 0x3f0   :  { %v1080_v39 = vpop.permute.xlu1 %1079  ;;  %v1078_v58 = vpop.permute.xlu0 %1077 }
 0x3f1   :  { %v1127_v38 = vsel %vm1125_vm4, %v1080_v39, -1e+30  ;;  %v1126_v45 = vsel %vm1125_vm4, %v1078_v58, -1e+30 }
 0x3f2   :  { %v2936_v41 = vmax.f32 %v2823_v50, %v1127_v38  ;;  %v2939_v63 = vmax.f32 %v2826_v24, %v1126_v45 }
 0x3f4   :  { %1176 = vrot.lane.b32.xlu1 %v2936_v41, %s1630_s11  ;;  %1174 = vrot.lane.b32.xlu0 %v2939_v63, %s1630_s11  ;;  %v1082_v21 = vpop.permute.xlu0 %1081 }
 0x3f5   :  { %v1128_v0 = vsel %vm1125_vm4, %v1082_v21, -1e+30 }
 0x3f6   :  { %v2948_v17 = vmax.f32 %v2835_v10, %v1128_v0 }
 0x3f8   :  { %v1084_v22 = vpop.permute.xlu1 %1083  ;;  %1178 = vrot.lane.b32.xlu0 %v2948_v17, %s1630_s11  ;;  %v1086_v50 = vpop.permute.xlu0 %1085 }
 0x3f9   :  { %v1129_v24 = vsel %vm1125_vm4, %v1084_v22, -1e+30  ;;  %v1130_v52 = vsel %vm1125_vm4, %v1086_v50, -1e+30 }
 0x3fa   :  { %v2957_v19 = vmax.f32 %v2844_v59, %v1129_v24  ;;  %v2960_v32 = vmax.f32 %v2847_v57, %v1130_v52 }
 0x3fc   :  { %1180 = vrot.lane.b32.xlu1 %v2957_v19, %s1630_s11  ;;  %v1088_v10 = vpop.permute.xlu1 %1087  ;;  %1182 = vrot.lane.b32.xlu0 %v2960_v32, %s1630_s11  ;;  %v1090_v46 = vpop.permute.xlu0 %1089 }
 0x3fd   :  { %v1131_v25 = vsel %vm1125_vm4, %v1088_v10, -1e+30  ;;  %v1132_v3 = vsel %vm1125_vm4, %v1090_v46, -1e+30 }
 0x3fe   :  { %v2971_v59 = vmax.f32 %v2858_v49, %v1131_v25  ;;  %v2974_v57 = vmax.f32 %v2861_v61, %v1132_v3 }
 0x400   :  { %1184 = vrot.lane.b32.xlu1 %v2971_v59, %s1630_s11  ;;  %v1092_v33 = vpop.permute.xlu1 %1091  ;;  %1186 = vrot.lane.b32.xlu0 %v2974_v57, %s1630_s11  ;;  %v1094_v56 = vpop.permute.xlu0 %1093 }
 0x401   :  { %v1133_v44 = vsel %vm1125_vm4, %v1092_v33, -1e+30  ;;  %v1134_v27 = vsel %vm1125_vm4, %v1094_v56, -1e+30 }
 0x402   :  { %v2985_v49 = vmax.f32 %v2872_v40, %v1133_v44  ;;  %v2988_v61 = vmax.f32 %v2875_v23, %v1134_v27 }
 0x404   :  { %1188 = vrot.lane.b32.xlu1 %v2985_v49, %s1630_s11  ;;  %v1096_v47 = vpop.permute.xlu1 %1095  ;;  %1190 = vrot.lane.b32.xlu0 %v2988_v61, %s1630_s11  ;;  %v1098_v60 = vpop.permute.xlu0 %1097 }
 0x405   :  { %v1135_v11 = vsel %vm1125_vm4, %v1096_v47, -1e+30  ;;  %v1136_v54 = vsel %vm1125_vm4, %v1098_v60, -1e+30 }
 0x406   :  { %v2999_v40 = vmax.f32 %v2886_v48, %v1135_v11  ;;  %v3002_v23 = vmax.f32 %v2889_v29, %v1136_v54 }
 0x408   :  { %1192 = vrot.lane.b32.xlu1 %v2999_v40, %s1630_s11  ;;  %v1100_v42 = vpop.permute.xlu1 %1099  ;;  %1194 = vrot.lane.b32.xlu0 %v3002_v23, %s1630_s11  ;;  %v1102_v53 = vpop.permute.xlu0 %1101 }
 0x409   :  { %v1137_v20 = vsel %vm1125_vm4, %v1100_v42, -1e+30  ;;  %v1138_v36 = vsel %vm1125_vm4, %v1102_v53, -1e+30 }
 0x40a   :  { %v3013_v48 = vmax.f32 %v2900_v43, %v1137_v20  ;;  %v3016_v29 = vmax.f32 %v2903_v15, %v1138_v36 }
 0x40c   :  { %1196 = vrot.lane.b32.xlu1 %v3013_v48, %s1630_s11  ;;  %v1104_v26 = vpop.permute.xlu1 %1103  ;;  %1198 = vrot.lane.b32.xlu0 %v3016_v29, %s1630_s11  ;;  %v1106_v62 = vpop.permute.xlu0 %1105 }
 0x40d   :  { %v1139_v35 = vsel %vm1125_vm4, %v1104_v26, -1e+30  ;;  %v1140_v55 = vsel %vm1125_vm4, %v1106_v62, -1e+30 }
 0x40e   :  { %v3027_v43 = vmax.f32 %v2914_v1, %v1139_v35  ;;  %v3030_v15 = vmax.f32 %v2917_v18, %v1140_v55 }
 0x410   :  { %1200 = vrot.lane.b32.xlu1 %v3027_v43, %s1630_s11  ;;  %v1108_v39 = vpop.permute.xlu1 %1107  ;;  %1202 = vrot.lane.b32.xlu0 %v3030_v15, %s1630_s11 }
 0x411   :  { %v1141_v58 = vsel %vm1125_vm4, %v1108_v39, -1e+30 }
 0x412   :  { %v3039_v38 = vmax.f32 %v2926_v13, %v1141_v58 }
 0x414   :  { %1204 = vrot.lane.b32.xlu1 %v3039_v38, %s1630_s11 }
 0x466   :  { %v1177_v1 = vpop.permute.xlu1 %1176  ;;  %v1175_v18 = vpop.permute.xlu0 %1174 }
 0x467   :  { %v1224_v45 = vsel %vm1222_vm12, %v1177_v1, -1e+30  ;;  %v1223_v21 = vsel %vm1222_vm12, %v1175_v18, -1e+30 }
 0x468   :  { %v3049_v0 = vmax.f32 %v2936_v41, %v1224_v45  ;;  %v3052_v22 = vmax.f32 %v2939_v63, %v1223_v21 }
 0x46a   :  { %1273 = vrot.lane.b32.xlu1 %v3049_v0, %s1631_s12  ;;  %1271 = vrot.lane.b32.xlu0 %v3052_v22, %s1631_s12  ;;  %v1179_v13 = vpop.permute.xlu0 %1178 }
 0x46b   :  { %v1225_v50 = vsel %vm1222_vm12, %v1179_v13, -1e+30 }
 0x46c   :  { %v3061_v24 = vmax.f32 %v2948_v17, %v1225_v50 }
 0x46e   :  { %v1181_v52 = vpop.permute.xlu1 %1180  ;;  %1275 = vrot.lane.b32.xlu0 %v3061_v24, %s1631_s12  ;;  %v1183_v41 = vpop.permute.xlu0 %1182 }
 0x46f   :  { %v1226_v63 = vsel %vm1222_vm12, %v1181_v52, -1e+30  ;;  %v1227_v10 = vsel %vm1222_vm12, %v1183_v41, -1e+30 }
 0x470   :  { %v3070_v46 = vmax.f32 %v2957_v19, %v1226_v63  ;;  %v3073_v25 = vmax.f32 %v2960_v32, %v1227_v10 }
 0x472   :  { %1277 = vrot.lane.b32.xlu1 %v3070_v46, %s1631_s12  ;;  %v1185_v17 = vpop.permute.xlu1 %1184  ;;  %1279 = vrot.lane.b32.xlu0 %v3073_v25, %s1631_s12  ;;  %v1187_v3 = vpop.permute.xlu0 %1186 }
 0x473   :  { %v1228_v33 = vsel %vm1222_vm12, %v1185_v17, -1e+30  ;;  %v1229_v56 = vsel %vm1222_vm12, %v1187_v3, -1e+30 }
 0x474   :  { %v3084_v19 = vmax.f32 %v2971_v59, %v1228_v33  ;;  %v3087_v32 = vmax.f32 %v2974_v57, %v1229_v56 }
 0x476   :  { %1281 = vrot.lane.b32.xlu1 %v3084_v19, %s1631_s12  ;;  %v1189_v44 = vpop.permute.xlu1 %1188  ;;  %1283 = vrot.lane.b32.xlu0 %v3087_v32, %s1631_s12  ;;  %v1191_v27 = vpop.permute.xlu0 %1190 }
 0x477   :  { %v1230_v47 = vsel %vm1222_vm12, %v1189_v44, -1e+30  ;;  %v1231_v60 = vsel %vm1222_vm12, %v1191_v27, -1e+30 }
 0x478   :  { %v3098_v59 = vmax.f32 %v2985_v49, %v1230_v47  ;;  %v3101_v57 = vmax.f32 %v2988_v61, %v1231_v60 }
 0x47a   :  { %1285 = vrot.lane.b32.xlu1 %v3098_v59, %s1631_s12  ;;  %v1193_v11 = vpop.permute.xlu1 %1192  ;;  %1287 = vrot.lane.b32.xlu0 %v3101_v57, %s1631_s12  ;;  %v1195_v54 = vpop.permute.xlu0 %1194 }
 0x47b   :  { %v1232_v42 = vsel %vm1222_vm12, %v1193_v11, -1e+30  ;;  %v1233_v53 = vsel %vm1222_vm12, %v1195_v54, -1e+30 }
 0x47c   :  { %v3112_v49 = vmax.f32 %v2999_v40, %v1232_v42  ;;  %v3115_v61 = vmax.f32 %v3002_v23, %v1233_v53 }
 0x47e   :  { %1289 = vrot.lane.b32.xlu1 %v3112_v49, %s1631_s12  ;;  %v1197_v20 = vpop.permute.xlu1 %1196  ;;  %1291 = vrot.lane.b32.xlu0 %v3115_v61, %s1631_s12  ;;  %v1199_v36 = vpop.permute.xlu0 %1198 }
 0x47f   :  { %v1234_v26 = vsel %vm1222_vm12, %v1197_v20, -1e+30  ;;  %v1235_v62 = vsel %vm1222_vm12, %v1199_v36, -1e+30 }
 0x480   :  { %v3126_v40 = vmax.f32 %v3013_v48, %v1234_v26  ;;  %v3129_v23 = vmax.f32 %v3016_v29, %v1235_v62 }
 0x482   :  { %1293 = vrot.lane.b32.xlu1 %v3126_v40, %s1631_s12  ;;  %v1201_v35 = vpop.permute.xlu1 %1200  ;;  %1295 = vrot.lane.b32.xlu0 %v3129_v23, %s1631_s12  ;;  %v1203_v55 = vpop.permute.xlu0 %1202 }
 0x483   :  { %v1236_v39 = vsel %vm1222_vm12, %v1201_v35, -1e+30  ;;  %v1237_v58 = vsel %vm1222_vm12, %v1203_v55, -1e+30 }
 0x484   :  { %v3140_v48 = vmax.f32 %v3027_v43, %v1236_v39  ;;  %v3143_v29 = vmax.f32 %v3030_v15, %v1237_v58 }
 0x486   :  { %1297 = vrot.lane.b32.xlu1 %v3140_v48, %s1631_s12  ;;  %v1205_v1 = vpop.permute.xlu1 %1204  ;;  %1299 = vrot.lane.b32.xlu0 %v3143_v29, %s1631_s12 }
 0x487   :  { %v1238_v18 = vsel %vm1222_vm12, %v1205_v1, -1e+30 }
 0x488   :  { %v3152_v45 = vmax.f32 %v3039_v38, %v1238_v18 }
 0x48a   :  { %1301 = vrot.lane.b32.xlu1 %v3152_v45, %s1631_s12 }
 0x4dc   :  { %v1274_v43 = vpop.permute.xlu1 %1273  ;;  %v1272_v15 = vpop.permute.xlu0 %1271 }
 0x4dd   :  { %v1321_v21 = vsel %vm1319_vm3, %v1274_v43, -1e+30  ;;  %v1320_v13 = vsel %vm1319_vm3, %v1272_v15, -1e+30 }
 0x4de   :  { %v3162_v50 = vmax.f32 %v3049_v0, %v1321_v21  ;;  %v3165_v52 = vmax.f32 %v3052_v22, %v1320_v13 }
 0x4e0   :  { %1370 = vrot.lane.b32.xlu1 %v3162_v50, %s1632_s13  ;;  %1368 = vrot.lane.b32.xlu0 %v3165_v52, %s1632_s13  ;;  %v1276_v38 = vpop.permute.xlu0 %1275 }
 0x4e1   :  { %v1322_v41 = vsel %vm1319_vm3, %v1276_v38, -1e+30 }
 0x4e2   :  { %v3174_v63 = vmax.f32 %v3061_v24, %v1322_v41 }
 0x4e4   :  { %v1278_v10 = vpop.permute.xlu1 %1277  ;;  %1372 = vrot.lane.b32.xlu0 %v3174_v63, %s1632_s13  ;;  %v1280_v0 = vpop.permute.xlu0 %1279 }
 0x4e5   :  { %v1323_v22 = vsel %vm1319_vm3, %v1278_v10, -1e+30  ;;  %v1324_v17 = vsel %vm1319_vm3, %v1280_v0, -1e+30 }
 0x4e6   :  { %v3183_v3 = vmax.f32 %v3070_v46, %v1323_v22  ;;  %v3186_v33 = vmax.f32 %v3073_v25, %v1324_v17 }
 0x4e8   :  { %1374 = vrot.lane.b32.xlu1 %v3183_v3, %s1632_s13  ;;  %v1282_v24 = vpop.permute.xlu1 %1281  ;;  %1376 = vrot.lane.b32.xlu0 %v3186_v33, %s1632_s13  ;;  %v1284_v56 = vpop.permute.xlu0 %1283 }
 0x4e9   :  { %v1325_v44 = vsel %vm1319_vm3, %v1282_v24, -1e+30  ;;  %v1326_v27 = vsel %vm1319_vm3, %v1284_v56, -1e+30 }
 0x4ea   :  { %v3197_v46 = vmax.f32 %v3084_v19, %v1325_v44  ;;  %v3200_v25 = vmax.f32 %v3087_v32, %v1326_v27 }
 0x4ec   :  { %1378 = vrot.lane.b32.xlu1 %v3197_v46, %s1632_s13  ;;  %v1286_v47 = vpop.permute.xlu1 %1285  ;;  %1380 = vrot.lane.b32.xlu0 %v3200_v25, %s1632_s13  ;;  %v1288_v60 = vpop.permute.xlu0 %1287 }
 0x4ed   :  { %v1327_v11 = vsel %vm1319_vm3, %v1286_v47, -1e+30  ;;  %v1328_v54 = vsel %vm1319_vm3, %v1288_v60, -1e+30 }
 0x4ee   :  { %v3211_v19 = vmax.f32 %v3098_v59, %v1327_v11  ;;  %v3214_v32 = vmax.f32 %v3101_v57, %v1328_v54 }
 0x4f0   :  { %1382 = vrot.lane.b32.xlu1 %v3211_v19, %s1632_s13  ;;  %v1290_v42 = vpop.permute.xlu1 %1289  ;;  %1384 = vrot.lane.b32.xlu0 %v3214_v32, %s1632_s13  ;;  %v1292_v53 = vpop.permute.xlu0 %1291 }
 0x4f1   :  { %v1329_v20 = vsel %vm1319_vm3, %v1290_v42, -1e+30  ;;  %v1330_v36 = vsel %vm1319_vm3, %v1292_v53, -1e+30 }
 0x4f2   :  { %v3225_v59 = vmax.f32 %v3112_v49, %v1329_v20  ;;  %v3228_v57 = vmax.f32 %v3115_v61, %v1330_v36 }
 0x4f4   :  { %1386 = vrot.lane.b32.xlu1 %v3225_v59, %s1632_s13  ;;  %v1294_v26 = vpop.permute.xlu1 %1293  ;;  %1388 = vrot.lane.b32.xlu0 %v3228_v57, %s1632_s13  ;;  %v1296_v62 = vpop.permute.xlu0 %1295 }
 0x4f5   :  { %v1331_v35 = vsel %vm1319_vm3, %v1294_v26, -1e+30  ;;  %v1332_v55 = vsel %vm1319_vm3, %v1296_v62, -1e+30 }
 0x4f6   :  { %v3239_v49 = vmax.f32 %v3126_v40, %v1331_v35  ;;  %v3242_v61 = vmax.f32 %v3129_v23, %v1332_v55 }
 0x4f8   :  { %1390 = vrot.lane.b32.xlu1 %v3239_v49, %s1632_s13  ;;  %v1298_v39 = vpop.permute.xlu1 %1297  ;;  %1392 = vrot.lane.b32.xlu0 %v3242_v61, %s1632_s13  ;;  %v1300_v58 = vpop.permute.xlu0 %1299 }
 0x4f9   :  { %v1333_v1 = vsel %vm1319_vm3, %v1298_v39, -1e+30  ;;  %v1334_v18 = vsel %vm1319_vm3, %v1300_v58, -1e+30 }
 0x4fa   :  { %v3253_v40 = vmax.f32 %v3140_v48, %v1333_v1  ;;  %v3256_v23 = vmax.f32 %v3143_v29, %v1334_v18 }
 0x4fc   :  { %1394 = vrot.lane.b32.xlu1 %v3253_v40, %s1632_s13  ;;  %v1302_v43 = vpop.permute.xlu1 %1301  ;;  %1396 = vrot.lane.b32.xlu0 %v3256_v23, %s1632_s13 }
 0x4fd   :  { %v1335_v15 = vsel %vm1319_vm3, %v1302_v43, -1e+30 }
 0x4fe   :  { %v3265_v21 = vmax.f32 %v3152_v45, %v1335_v15 }
 0x500   :  { %1398 = vrot.lane.b32.xlu1 %v3265_v21, %s1632_s13 }
 0x552   :  { %v1369_v48 = vpop.permute.xlu0 %1368  ;;  %v1371_v13 = vpop.permute.xlu1 %1370 }
 0x553   :  { %v1418_v24 = vsel %vm1416_vm9, %v1371_v13, -1e+30  ;;  %v1417_v45 = vsel %vm1416_vm9, %v1369_v48, -1e+30 }
 0x554   :  { %v1434_v11 = vmax.f32 %v3162_v50, %v1418_v24  ;;  %v1433_v54 = vmax.f32 %v3165_v52, %v1417_v45 }
 0x556   :  { %v1373_v29 = vpop.permute.xlu0 %1372  ;;  %v1450_v1 = vsel %vm380_vm6, %v1434_v11, 1e+30  ;;  %vm3482_vm6 = vcmp.le.s32.totalorder %v1700_v14, %v1649_v2 }
 0x557   :  { %v1419_v53 = vsel %vm1416_vm9, %v1373_v29, -1e+30 }
 0x558   :  { %v1435_v18 = vmax.f32 %v3174_v63, %v1419_v53 }
 0x55a   :  { %v1375_v38 = vpop.permute.xlu1 %1374  ;;  %v1377_v41 = vpop.permute.xlu0 %1376  ;;  %v1451_v14 = vsel %vm381_vm10, %v1435_v18, 1e+30  ;;  %vm3484_vm10 = vcmp.le.s32.totalorder %v3477_v7, %v1649_v2 }
 0x55b   :  { %v1421_v56 = vsel %vm1416_vm9, %v1377_v41, -1e+30  ;;  %v1420_v26 = vsel %vm1416_vm9, %v1375_v38, -1e+30 }
 0x55c   :  { %v1437_v20 = vmax.f32 %v3186_v33, %v1421_v56 }
 0x55e   :  { %v1379_v10 = vpop.permute.xlu1 %1378  ;;  %v1381_v0 = vpop.permute.xlu0 %1380  ;;  %v1453_v15 = vsel %vm383_vm2, %v1437_v20, 1e+30  ;;  %vm3486_vm2 = vcmp.le.s32.totalorder %v1772_v30, %v1649_v2 }
 0x55f   :  { %v1422_v47 = vsel %vm1416_vm9, %v1379_v10, -1e+30  ;;  %v1423_v60 = vsel %vm1416_vm9, %v1381_v0, -1e+30 }
 0x560   :  { %v1438_v62 = vmax.f32 %v3197_v46, %v1422_v47  ;;  %v1439_v50 = vmax.f32 %v3200_v25, %v1423_v60  ;;  %v3480_v46 = vld [vmem:[#allocation5_spill] sm:$0xff] }
 0x561   :  { %vm3481_vm7 = vcmp.le.s32.totalorder %v3480_v46, %v1649_v2 }
 0x562   :  { %v1383_v22 = vpop.permute.xlu1 %1382  ;;  %v1385_v17 = vpop.permute.xlu0 %1384  ;;  %v1449_v25 = vsel %vm3481_vm7, %v1433_v54, 1e+30  ;;  %v1454_v13 = vsel %vm384_vm0, %v1438_v62, 1e+30  ;;  %v1455_v63 = vsel %vm385_vm1, %v1439_v50, 1e+30  ;;  %vm3483_vm0 = vcmp.le.s32.totalorder %v1709_v16, %v1649_v2 }
 0x563   :  { %v1424_v42 = vsel %vm1416_vm9, %v1383_v22, -1e+30  ;;  %v1425_v52 = vsel %vm1416_vm9, %v1385_v17, -1e+30  ;;  %v1466_v0 = vmin.f32 %v1450_v1, %v1454_v13  ;;  %v1465_v22 = vmin.f32 %v1449_v25, %v1453_v15 }
 0x564   :  { %v1440_v39 = vmax.f32 %v3211_v19, %v1424_v42  ;;  %v1436_v19 = vmax.f32 %v3183_v3, %v1420_v26  ;;  %v1441_v48 = vmax.f32 %v3214_v32, %v1425_v52  ;;  %v3487_v26 = vld [vmem:[#allocation11_spill] sm:$0xff]  ;;  %vm1495_vm1 = vcmask 0  }
 0x565   :  { %v1486_v62 = vsub.f32 16.0, %v3487_v26 }
 0x566   :  { %v1387_v44 = vpop.permute.xlu1 %1386  ;;  %v1389_v27 = vpop.permute.xlu0 %1388  ;;  %v1456_v32 = vsel %vm3482_vm6, %v1440_v39, 1e+30  ;;  %v1452_v10 = vsel %vm382_vm8, %v1436_v19, 1e+30  ;;  %v1457_v34 = vsel %vm3483_vm0, %v1441_v48, 1e+30  ;;  %vm3485_vm8 = vcmp.le.s32.totalorder %v1763_v28, %v1649_v2 }
 0x567   :  { %v1426_v36 = vsel %vm1416_vm9, %v1387_v44, -1e+30  ;;  %v1427_v33 = vsel %vm1416_vm9, %v1389_v27, -1e+30  ;;  %v1468_v17 = vmin.f32 %v1452_v10, %v1456_v32  ;;  %v1469_v56 = vmin.f32 %v1465_v22, %v1457_v34 }
 0x568   :  { %v1442_v43 = vmax.f32 %v3225_v59, %v1426_v36  ;;  %v1443_v59 = vmax.f32 %v3228_v57, %v1427_v33  ;;  %v1487_v52 = vmul.f32 10.0, %v1486_v62 }
 0x56a   :  { %v1391_v35 = vpop.permute.xlu1 %1390  ;;  %v1393_v55 = vpop.permute.xlu0 %1392  ;;  %v1458_v12 = vsel %vm388_vm5, %v1442_v43, 1e+30 }
 0x56b   :  { %v1428_v58 = vsel %vm1416_vm9, %v1391_v35, -1e+30  ;;  %v1429_v5 = vsel %vm1416_vm9, %v1393_v55, -1e+30  ;;  %v1470_v24 = vmin.f32 %v1466_v0, %v1458_v12  ;;  %v3488_v55 = vld [vmem:[#allocation12_spill] sm:$0xff] }
 0x56c   :  { %v1444_v3 = vmax.f32 %v3239_v49, %v1428_v58  ;;  %v1445_v57 = vmax.f32 %v3242_v61, %v1429_v5  ;;  %v1459_v61 = vsel %vm389_vm15, %v1443_v59, 1e+30  ;;  %v1489_v39 = vmul.f32 0.0625, %v3488_v55 }
 0x56e   :  { %v1395_v29 = vpop.permute.xlu1 %1394  ;;  %v1397_v8 = vpop.permute.xlu0 %1396  ;;  %v1461_v37 = vsel %vm391_vm14, %v1445_v57, 1e+30 }
 0x56f   :  { %v1430_v38 = vsel %vm1416_vm9, %v1395_v29, -1e+30  ;;  %v1431_v9 = vsel %vm1416_vm9, %v1397_v8, -1e+30  ;;  %v1473_v60 = vmin.f32 %v1469_v56, %v1461_v37 }
 0x570   :  { %v1446_v49 = vmax.f32 %v3253_v40, %v1430_v38  ;;  %v1447_v41 = vmax.f32 %v3256_v23, %v1431_v9  ;;  %v1460_v40 = vsel %vm390_vm11, %v1444_v3, 1e+30  ;;  %v1467_v23 = vmin.f32 %v1451_v14, %v1455_v63 }
 0x571   :  { %v1472_v44 = vmin.f32 %v1468_v17, %v1460_v40 }
 0x572   :  { %v1462_v4 = vsel %vm3484_vm10, %v1446_v49, 1e+30  ;;  %v1399_v6 = vpop.permute.xlu1 %1398  ;;  %v1463_v31 = vsel %vm3485_vm8, %v1447_v41, 1e+30  ;;  %v1471_v7 = vmin.f32 %v1467_v23, %v1459_v61 }
 0x573   :  { %v1432_v16 = vsel %vm1416_vm9, %v1399_v6, -1e+30  ;;  %v1474_v27 = vmin.f32 %v1470_v24, %v1462_v4 }
 0x574   :  { %v1448_v45 = vmax.f32 %v3265_v21, %v1432_v16  ;;  %v1475_v11 = vmin.f32 %v1471_v7, %v1463_v31 }
 0x575   :  { %v1477_v42 = vmin.f32 %v1473_v60, %v1474_v27 }
 0x576   :  { %v1464_v47 = vsel %vm3486_vm2, %v1448_v45, 1e+30 }
 0x577   :  { %v1476_v54 = vmin.f32 %v1472_v44, %v1464_v47 }
 0x579   :  { %v1478_v51 = vmin.f32 %v1475_v11, %v1476_v54 }
 0x57b   :  { %v1479_v53 = vmin.f32 %v1477_v42, %v1478_v51 }
 0x57d   :  { %v1480_v20 = vrot.slane %v1479_v53, 4 }
 0x57f   :  { %v1481_v36 = vmin.f32 %v1479_v53, %v1480_v20 }
 0x581   :  { %v1482_v28 = vrot.slane %v1481_v36, 2 }
 0x583   :  { %v1483_v21 = vmin.f32 %v1481_v36, %v1482_v28 }
 0x585   :  { %v1484_v50 = vrot.slane %v1483_v21, 1 }
 0x587   :  { %v1485_v35 = vmin.f32 %v1483_v21, %v1484_v50 }
 0x589   :  { %v1488_v33 = vsub.f32 %v1485_v35, %v1487_v52 }
 0x58b   :  { %v1490_v30 = vsub.f32 %v1489_v39, %v1488_v33 }
 0x58d   :  { %v1491_v58 = vand.u32 2147483647, %v1490_v30 }
 0x58f   :  { %v1492_v1 = vsel %vm329_vm13, %v1491_v58, -1.0 }
 0x590   :  { %1493 = vmax.xlane.f32.xlu0 %v1492_v1 }
 0x61d   :  { %v1494_v46 = vpop.xlane.xlu0 %1493 }
 0x61e   :  { %1496 = vst.msk [vmem:[#allocation2] sm:$0x1] %vm1495_vm1, %v1494_v46 }
 0x61f   :  { %1612 = shalt.err (!%p1609_p4)
}
 0x620   :  { %s1613_s20 = scalar_lea.hbm %s3383_s1, 16 }
 0x621   :  { %p1614_p5 = scmp.ne.s32.totalorder %s3383_s1, %s1613_s20  ;;  %p1617_p6 = scmp.lt.u32.totalorder %s1613_s20, %s3383_s1 }
 0x623   :  { %p1619_p7 = pnand %p1617_p6, %p1614_p5 }
 0x625   :  { %1622 = shalt.err (!%p1619_p7)
}
 0x626   :  { %1506 = dma.vmem_to_hbm [thread:$0]  %s1504_s15, 16, %s3383_s1, [#allocation3]  }
 0x627   :  { %1623 = dma.done.wait [#allocation3], 16  }
 0x628   :  { %1624 = vsyncadd [#allocation3], 4294967280 }
 0x629   :  { %1510 = vsyncpa [#allocation3], 1 }

</bundles_post_ra>
